<compile_context>
chip_gen: v5e
topology: v5e:2x2
jax: 0.10.0
libtpu: 0.0.40
codegen_flags: <defaults>
</compile_context>

<pallas_src>
import jax
import jax.numpy as jnp
from jax.experimental import pallas as pl
from jax.experimental.pallas import tpu as pltpu

# Logical layer sizes of the PyTorch module: 2 -> 4 -> 6 -> 10 -> 6 -> 2 -> 1.
LAYER_DIMS = [2, 4, 6, 10, 6, 2, 1]
NUM_LAYERS = len(LAYER_DIMS) - 1      # 6
IN_DIM = LAYER_DIMS[0]                # 2
OUT_DIM = LAYER_DIMS[-1]              # 1
LANE = 128
SUB = 8
MIN_TILE_B = SUB * LANE               # 1024: smallest legal batch tile
MAX_TILE_B = 16 * MIN_TILE_B          # 16384 rows/tile -> (128,128) f32 slabs
NUM_PARAMS = sum(LAYER_DIMS[i] * LAYER_DIMS[i + 1] + LAYER_DIMS[i + 1]
                 for i in range(NUM_LAYERS))   # 195 scalars


def _round_up(n, m):
    return ((n + m - 1) // m) * m


def _mlp_kernel(p_ref, x_ref, o_ref):
    """VPU-unrolled fused MLP for one batch tile.

    p_ref: (NUM_PARAMS,) f32 SMEM — per layer: row-major W[(out,in)] then b.
    x_ref: (IN_DIM, TILE_R, 128) f32 VMEM — batch on (sublane, lane).
    o_ref: (TILE_R, 128) f32 VMEM — the single output feature, lane-dense.
    """
    # Current activations: one (TILE_R, 128) f32 slab per real feature.
    feats = [x_ref[f] for f in range(IN_DIM)]

    idx = 0
    for layer in range(NUM_LAYERS):
        fan_in, fan_out = LAYER_DIMS[layer], LAYER_DIMS[layer + 1]
        w_off = idx
        b_off = idx + fan_in * fan_out
        new_feats = []
        for o in range(fan_out):
            # Static SMEM scalar reads; each broadcast-multiply-add is one VPU
            # pass over the (TILE_R, 128) slab.  Everything stays f32.
            acc = feats[0] * p_ref[w_off + o * fan_in]
            for i in range(1, fan_in):
                acc = acc + feats[i] * p_ref[w_off + o * fan_in + i]
            acc = acc + p_ref[b_off + o]                       # bias
            if layer < NUM_LAYERS - 1:
                acc = jnp.maximum(acc, 0.0)                    # ReLU
            new_feats.append(acc)
        feats = new_feats
        idx = b_off + fan_out

    o_ref[...] = feats[0]


@jax.jit
def mlp_forward(x, params_flat):
    """x: (batch, 2) f32; params_flat: (NUM_PARAMS,) f32 -> (batch, 1) f32."""
    batch = x.shape[0]

    # >= 2 grid steps so v7x megacore shards the batch across both TensorCores
    # (harmless on v5e/v6e); tiles are multiples of 1024 rows (8 sublanes x
    # 128 lanes) and capped at MAX_TILE_B.
    half = -(-batch // 2)
    tile_b = min(MAX_TILE_B, _round_up(half, MIN_TILE_B))
    num_tiles = max(2, -(-batch // tile_b))
    bp = num_tiles * tile_b
    tile_r = tile_b // LANE

    # Feature-major, zero-padded, packed as (IN_DIM, bp//128, 128): batch lives
    # on (sublane, lane) so each feature is a lane-dense slab for the VPU.
    # (A producer that already supplies feature-major input would skip this.)
    x_t = jnp.zeros((IN_DIM, bp), jnp.float32).at[:, :batch].set(x.T)
    x3 = x_t.reshape(IN_DIM, bp // LANE, LANE)

    out = pl.pallas_call(
        _mlp_kernel,
        out_shape=jax.ShapeDtypeStruct((bp // LANE, LANE), jnp.float32),
        grid=(num_tiles,),
        in_specs=[
            # ~195 f32 scalars, resident in SMEM for the whole grid.
            pl.BlockSpec(memory_space=pltpu.MemorySpace.SMEM),
            pl.BlockSpec((IN_DIM, tile_r, LANE), lambda i: (0, i, 0)),
        ],
        out_specs=pl.BlockSpec((tile_r, LANE), lambda i: (i, 0)),
        compiler_params=pltpu.CompilerParams(
            dimension_semantics=("parallel",),
            vmem_limit_bytes=32 * 1024 * 1024),
    )(params_flat, x3)

    return out.reshape(bp)[:batch].reshape(batch, OUT_DIM)


def init_params(key):
    """Mirror the PyTorch init: xavier_uniform weights (gain=sqrt(2) for the
    ReLU layers, gain=1 for the last) and nn.Linear default uniform biases.
    Returns the flat f32 param vector (kernel input) and the raw (w, b) list
    for the pure-JAX reference."""
    gains = [2.0 ** 0.5] * (NUM_LAYERS - 1) + [1.0]
    flat_parts = []
    raw = []
    for layer in range(NUM_LAYERS):
        fan_in, fan_out = LAYER_DIMS[layer], LAYER_DIMS[layer + 1]
        key, kw, kb = jax.random.split(key, 3)
        bound_w = gains[layer] * (6.0 / (fan_in + fan_out)) ** 0.5
        w = jax.random.uniform(kw, (fan_out, fan_in), jnp.float32,
                               minval=-bound_w, maxval=bound_w)
        bound_b = 1.0 / (fan_in ** 0.5)
        b = jax.random.uniform(kb, (fan_out,), jnp.float32,
                               minval=-bound_b, maxval=bound_b)
        raw.append((w, b))
        flat_parts.append(w.reshape(-1))
        flat_parts.append(b)
    params_flat = jnp.concatenate(flat_parts)
    assert params_flat.shape == (NUM_PARAMS,)
    return params_flat, raw


def reference_forward(x, raw_params):
    """Pure-JAX f32 reference matching the PyTorch forward."""
    h = x
    for layer, (w, b) in enumerate(raw_params):
        z = jnp.dot(h, w.T, precision=jax.lax.Precision.HIGHEST) + b
        h = jnp.maximum(z, 0.0) if layer < NUM_LAYERS - 1 else z
    return h


if __name__ == "__main__":
    key = jax.random.PRNGKey(0)
    key, kx = jax.random.split(key)

    batch = 8
    x = jax.random.normal(kx, (batch, IN_DIM), jnp.float32)

    params_flat, raw_params = init_params(key)

    y = mlp_forward(x, params_flat)
    y = jax.block_until_ready(y)

    y_ref = reference_forward(x, raw_params)
    assert y.shape == (batch, OUT_DIM), y.shape
    # Full f32 path in-kernel -> tight tolerance (only summation-order diffs).
    assert jnp.allclose(y, y_ref, atol=1e-4, rtol=1e-4), (y, y_ref)

    print("KERNEL_OK")
</pallas_src>

<mosaic_0001>
module attributes {stable_mosaic.version = 11 : i64} {
  func.func @_mlp_kernel(%arg0: i32, %arg1: memref<195xf32, #tpu.memory_space<smem>>, %arg2: memref<2x8x128xf32, #tpu.memory_space<vmem>>, %arg3: memref<8x128xf32, #tpu.memory_space<vmem>>) attributes {dimension_semantics = [#tpu.dimension_semantics<parallel>], iteration_bounds = array<i64: 2>, scalar_prefetch = 0 : i64, scratch_operands = 0 : i64, tpu.core_type = #tpu.core_type<tc>, window_params = [{transform_indices = @transform_0, window_bounds = array<i64: 195>}, {transform_indices = @transform_1, window_bounds = array<i64: 2, 8, 128>}, {transform_indices = @transform_2, window_bounds = array<i64: 8, 128>}]} {
    %c0 = arith.constant 0 : index
    %c0_0 = arith.constant 0 : index
    %c0_1 = arith.constant 0 : index
    %0 = vector.load %arg2[%c0, %c0_0, %c0_1] : memref<2x8x128xf32, #tpu.memory_space<vmem>>, vector<1x8x128xf32>
    %1 = vector.shape_cast %0 : vector<1x8x128xf32> to vector<8x128xf32>
    %c1 = arith.constant 1 : index
    %c0_2 = arith.constant 0 : index
    %c0_3 = arith.constant 0 : index
    %2 = vector.load %arg2[%c1, %c0_2, %c0_3] : memref<2x8x128xf32, #tpu.memory_space<vmem>>, vector<1x8x128xf32>
    %3 = vector.shape_cast %2 : vector<1x8x128xf32> to vector<8x128xf32>
    %c0_4 = arith.constant 0 : index
    %4 = memref.load %arg1[%c0_4] : memref<195xf32, #tpu.memory_space<smem>>
    %5 = vector.broadcast %4 : f32 to vector<8x128xf32>
    %6 = arith.mulf %1, %5 : vector<8x128xf32>
    %c1_5 = arith.constant 1 : index
    %7 = memref.load %arg1[%c1_5] : memref<195xf32, #tpu.memory_space<smem>>
    %8 = vector.broadcast %7 : f32 to vector<8x128xf32>
    %9 = arith.mulf %3, %8 : vector<8x128xf32>
    %10 = arith.addf %6, %9 : vector<8x128xf32>
    %c8 = arith.constant 8 : index
    %11 = memref.load %arg1[%c8] : memref<195xf32, #tpu.memory_space<smem>>
    %12 = vector.broadcast %11 : f32 to vector<8x128xf32>
    %13 = arith.addf %10, %12 : vector<8x128xf32>
    %cst = arith.constant 0.000000e+00 : f32
    %14 = vector.broadcast %cst : f32 to vector<8x128xf32>
    %15 = arith.maximumf %13, %14 : vector<8x128xf32>
    %c2 = arith.constant 2 : index
    %16 = memref.load %arg1[%c2] : memref<195xf32, #tpu.memory_space<smem>>
    %17 = vector.broadcast %16 : f32 to vector<8x128xf32>
    %18 = arith.mulf %1, %17 : vector<8x128xf32>
    %c3 = arith.constant 3 : index
    %19 = memref.load %arg1[%c3] : memref<195xf32, #tpu.memory_space<smem>>
    %20 = vector.broadcast %19 : f32 to vector<8x128xf32>
    %21 = arith.mulf %3, %20 : vector<8x128xf32>
    %22 = arith.addf %18, %21 : vector<8x128xf32>
    %c9 = arith.constant 9 : index
    %23 = memref.load %arg1[%c9] : memref<195xf32, #tpu.memory_space<smem>>
    %24 = vector.broadcast %23 : f32 to vector<8x128xf32>
    %25 = arith.addf %22, %24 : vector<8x128xf32>
    %cst_6 = arith.constant 0.000000e+00 : f32
    %26 = vector.broadcast %cst_6 : f32 to vector<8x128xf32>
    %27 = arith.maximumf %25, %26 : vector<8x128xf32>
    %c4 = arith.constant 4 : index
    %28 = memref.load %arg1[%c4] : memref<195xf32, #tpu.memory_space<smem>>
    %29 = vector.broadcast %28 : f32 to vector<8x128xf32>
    %30 = arith.mulf %1, %29 : vector<8x128xf32>
    %c5 = arith.constant 5 : index
    %31 = memref.load %arg1[%c5] : memref<195xf32, #tpu.memory_space<smem>>
    %32 = vector.broadcast %31 : f32 to vector<8x128xf32>
    %33 = arith.mulf %3, %32 : vector<8x128xf32>
    %34 = arith.addf %30, %33 : vector<8x128xf32>
    %c10 = arith.constant 10 : index
    %35 = memref.load %arg1[%c10] : memref<195xf32, #tpu.memory_space<smem>>
    %36 = vector.broadcast %35 : f32 to vector<8x128xf32>
    %37 = arith.addf %34, %36 : vector<8x128xf32>
    %cst_7 = arith.constant 0.000000e+00 : f32
    %38 = vector.broadcast %cst_7 : f32 to vector<8x128xf32>
    %39 = arith.maximumf %37, %38 : vector<8x128xf32>
    %c6 = arith.constant 6 : index
    %40 = memref.load %arg1[%c6] : memref<195xf32, #tpu.memory_space<smem>>
    %41 = vector.broadcast %40 : f32 to vector<8x128xf32>
    %42 = arith.mulf %1, %41 : vector<8x128xf32>
    %c7 = arith.constant 7 : index
    %43 = memref.load %arg1[%c7] : memref<195xf32, #tpu.memory_space<smem>>
    %44 = vector.broadcast %43 : f32 to vector<8x128xf32>
    %45 = arith.mulf %3, %44 : vector<8x128xf32>
    %46 = arith.addf %42, %45 : vector<8x128xf32>
    %c11 = arith.constant 11 : index
    %47 = memref.load %arg1[%c11] : memref<195xf32, #tpu.memory_space<smem>>
    %48 = vector.broadcast %47 : f32 to vector<8x128xf32>
    %49 = arith.addf %46, %48 : vector<8x128xf32>
    %cst_8 = arith.constant 0.000000e+00 : f32
    %50 = vector.broadcast %cst_8 : f32 to vector<8x128xf32>
    %51 = arith.maximumf %49, %50 : vector<8x128xf32>
    %c12 = arith.constant 12 : index
    %52 = memref.load %arg1[%c12] : memref<195xf32, #tpu.memory_space<smem>>
    %53 = vector.broadcast %52 : f32 to vector<8x128xf32>
    %54 = arith.mulf %15, %53 : vector<8x128xf32>
    %c13 = arith.constant 13 : index
    %55 = memref.load %arg1[%c13] : memref<195xf32, #tpu.memory_space<smem>>
    %56 = vector.broadcast %55 : f32 to vector<8x128xf32>
    %57 = arith.mulf %27, %56 : vector<8x128xf32>
    %58 = arith.addf %54, %57 : vector<8x128xf32>
    %c14 = arith.constant 14 : index
    %59 = memref.load %arg1[%c14] : memref<195xf32, #tpu.memory_space<smem>>
    %60 = vector.broadcast %59 : f32 to vector<8x128xf32>
    %61 = arith.mulf %39, %60 : vector<8x128xf32>
    %62 = arith.addf %58, %61 : vector<8x128xf32>
    %c15 = arith.constant 15 : index
    %63 = memref.load %arg1[%c15] : memref<195xf32, #tpu.memory_space<smem>>
    %64 = vector.broadcast %63 : f32 to vector<8x128xf32>
    %65 = arith.mulf %51, %64 : vector<8x128xf32>
    %66 = arith.addf %62, %65 : vector<8x128xf32>
    %c36 = arith.constant 36 : index
    %67 = memref.load %arg1[%c36] : memref<195xf32, #tpu.memory_space<smem>>
    %68 = vector.broadcast %67 : f32 to vector<8x128xf32>
    %69 = arith.addf %66, %68 : vector<8x128xf32>
    %cst_9 = arith.constant 0.000000e+00 : f32
    %70 = vector.broadcast %cst_9 : f32 to vector<8x128xf32>
    %71 = arith.maximumf %69, %70 : vector<8x128xf32>
    %c16 = arith.constant 16 : index
    %72 = memref.load %arg1[%c16] : memref<195xf32, #tpu.memory_space<smem>>
    %73 = vector.broadcast %72 : f32 to vector<8x128xf32>
    %74 = arith.mulf %15, %73 : vector<8x128xf32>
    %c17 = arith.constant 17 : index
    %75 = memref.load %arg1[%c17] : memref<195xf32, #tpu.memory_space<smem>>
    %76 = vector.broadcast %75 : f32 to vector<8x128xf32>
    %77 = arith.mulf %27, %76 : vector<8x128xf32>
    %78 = arith.addf %74, %77 : vector<8x128xf32>
    %c18 = arith.constant 18 : index
    %79 = memref.load %arg1[%c18] : memref<195xf32, #tpu.memory_space<smem>>
    %80 = vector.broadcast %79 : f32 to vector<8x128xf32>
    %81 = arith.mulf %39, %80 : vector<8x128xf32>
    %82 = arith.addf %78, %81 : vector<8x128xf32>
    %c19 = arith.constant 19 : index
    %83 = memref.load %arg1[%c19] : memref<195xf32, #tpu.memory_space<smem>>
    %84 = vector.broadcast %83 : f32 to vector<8x128xf32>
    %85 = arith.mulf %51, %84 : vector<8x128xf32>
    %86 = arith.addf %82, %85 : vector<8x128xf32>
    %c37 = arith.constant 37 : index
    %87 = memref.load %arg1[%c37] : memref<195xf32, #tpu.memory_space<smem>>
    %88 = vector.broadcast %87 : f32 to vector<8x128xf32>
    %89 = arith.addf %86, %88 : vector<8x128xf32>
    %cst_10 = arith.constant 0.000000e+00 : f32
    %90 = vector.broadcast %cst_10 : f32 to vector<8x128xf32>
    %91 = arith.maximumf %89, %90 : vector<8x128xf32>
    %c20 = arith.constant 20 : index
    %92 = memref.load %arg1[%c20] : memref<195xf32, #tpu.memory_space<smem>>
    %93 = vector.broadcast %92 : f32 to vector<8x128xf32>
    %94 = arith.mulf %15, %93 : vector<8x128xf32>
    %c21 = arith.constant 21 : index
    %95 = memref.load %arg1[%c21] : memref<195xf32, #tpu.memory_space<smem>>
    %96 = vector.broadcast %95 : f32 to vector<8x128xf32>
    %97 = arith.mulf %27, %96 : vector<8x128xf32>
    %98 = arith.addf %94, %97 : vector<8x128xf32>
    %c22 = arith.constant 22 : index
    %99 = memref.load %arg1[%c22] : memref<195xf32, #tpu.memory_space<smem>>
    %100 = vector.broadcast %99 : f32 to vector<8x128xf32>
    %101 = arith.mulf %39, %100 : vector<8x128xf32>
    %102 = arith.addf %98, %101 : vector<8x128xf32>
    %c23 = arith.constant 23 : index
    %103 = memref.load %arg1[%c23] : memref<195xf32, #tpu.memory_space<smem>>
    %104 = vector.broadcast %103 : f32 to vector<8x128xf32>
    %105 = arith.mulf %51, %104 : vector<8x128xf32>
    %106 = arith.addf %102, %105 : vector<8x128xf32>
    %c38 = arith.constant 38 : index
    %107 = memref.load %arg1[%c38] : memref<195xf32, #tpu.memory_space<smem>>
    %108 = vector.broadcast %107 : f32 to vector<8x128xf32>
    %109 = arith.addf %106, %108 : vector<8x128xf32>
    %cst_11 = arith.constant 0.000000e+00 : f32
    %110 = vector.broadcast %cst_11 : f32 to vector<8x128xf32>
    %111 = arith.maximumf %109, %110 : vector<8x128xf32>
    %c24 = arith.constant 24 : index
    %112 = memref.load %arg1[%c24] : memref<195xf32, #tpu.memory_space<smem>>
    %113 = vector.broadcast %112 : f32 to vector<8x128xf32>
    %114 = arith.mulf %15, %113 : vector<8x128xf32>
    %c25 = arith.constant 25 : index
    %115 = memref.load %arg1[%c25] : memref<195xf32, #tpu.memory_space<smem>>
    %116 = vector.broadcast %115 : f32 to vector<8x128xf32>
    %117 = arith.mulf %27, %116 : vector<8x128xf32>
    %118 = arith.addf %114, %117 : vector<8x128xf32>
    %c26 = arith.constant 26 : index
    %119 = memref.load %arg1[%c26] : memref<195xf32, #tpu.memory_space<smem>>
    %120 = vector.broadcast %119 : f32 to vector<8x128xf32>
    %121 = arith.mulf %39, %120 : vector<8x128xf32>
    %122 = arith.addf %118, %121 : vector<8x128xf32>
    %c27 = arith.constant 27 : index
    %123 = memref.load %arg1[%c27] : memref<195xf32, #tpu.memory_space<smem>>
    %124 = vector.broadcast %123 : f32 to vector<8x128xf32>
    %125 = arith.mulf %51, %124 : vector<8x128xf32>
    %126 = arith.addf %122, %125 : vector<8x128xf32>
    %c39 = arith.constant 39 : index
    %127 = memref.load %arg1[%c39] : memref<195xf32, #tpu.memory_space<smem>>
    %128 = vector.broadcast %127 : f32 to vector<8x128xf32>
    %129 = arith.addf %126, %128 : vector<8x128xf32>
    %cst_12 = arith.constant 0.000000e+00 : f32
    %130 = vector.broadcast %cst_12 : f32 to vector<8x128xf32>
    %131 = arith.maximumf %129, %130 : vector<8x128xf32>
    %c28 = arith.constant 28 : index
    %132 = memref.load %arg1[%c28] : memref<195xf32, #tpu.memory_space<smem>>
    %133 = vector.broadcast %132 : f32 to vector<8x128xf32>
    %134 = arith.mulf %15, %133 : vector<8x128xf32>
    %c29 = arith.constant 29 : index
    %135 = memref.load %arg1[%c29] : memref<195xf32, #tpu.memory_space<smem>>
    %136 = vector.broadcast %135 : f32 to vector<8x128xf32>
    %137 = arith.mulf %27, %136 : vector<8x128xf32>
    %138 = arith.addf %134, %137 : vector<8x128xf32>
    %c30 = arith.constant 30 : index
    %139 = memref.load %arg1[%c30] : memref<195xf32, #tpu.memory_space<smem>>
    %140 = vector.broadcast %139 : f32 to vector<8x128xf32>
    %141 = arith.mulf %39, %140 : vector<8x128xf32>
    %142 = arith.addf %138, %141 : vector<8x128xf32>
    %c31 = arith.constant 31 : index
    %143 = memref.load %arg1[%c31] : memref<195xf32, #tpu.memory_space<smem>>
    %144 = vector.broadcast %143 : f32 to vector<8x128xf32>
    %145 = arith.mulf %51, %144 : vector<8x128xf32>
    %146 = arith.addf %142, %145 : vector<8x128xf32>
    %c40 = arith.constant 40 : index
    %147 = memref.load %arg1[%c40] : memref<195xf32, #tpu.memory_space<smem>>
    %148 = vector.broadcast %147 : f32 to vector<8x128xf32>
    %149 = arith.addf %146, %148 : vector<8x128xf32>
    %cst_13 = arith.constant 0.000000e+00 : f32
    %150 = vector.broadcast %cst_13 : f32 to vector<8x128xf32>
    %151 = arith.maximumf %149, %150 : vector<8x128xf32>
    %c32 = arith.constant 32 : index
    %152 = memref.load %arg1[%c32] : memref<195xf32, #tpu.memory_space<smem>>
    %153 = vector.broadcast %152 : f32 to vector<8x128xf32>
    %154 = arith.mulf %15, %153 : vector<8x128xf32>
    %c33 = arith.constant 33 : index
    %155 = memref.load %arg1[%c33] : memref<195xf32, #tpu.memory_space<smem>>
    %156 = vector.broadcast %155 : f32 to vector<8x128xf32>
    %157 = arith.mulf %27, %156 : vector<8x128xf32>
    %158 = arith.addf %154, %157 : vector<8x128xf32>
    %c34 = arith.constant 34 : index
    %159 = memref.load %arg1[%c34] : memref<195xf32, #tpu.memory_space<smem>>
    %160 = vector.broadcast %159 : f32 to vector<8x128xf32>
    %161 = arith.mulf %39, %160 : vector<8x128xf32>
    %162 = arith.addf %158, %161 : vector<8x128xf32>
    %c35 = arith.constant 35 : index
    %163 = memref.load %arg1[%c35] : memref<195xf32, #tpu.memory_space<smem>>
    %164 = vector.broadcast %163 : f32 to vector<8x128xf32>
    %165 = arith.mulf %51, %164 : vector<8x128xf32>
    %166 = arith.addf %162, %165 : vector<8x128xf32>
    %c41 = arith.constant 41 : index
    %167 = memref.load %arg1[%c41] : memref<195xf32, #tpu.memory_space<smem>>
    %168 = vector.broadcast %167 : f32 to vector<8x128xf32>
    %169 = arith.addf %166, %168 : vector<8x128xf32>
    %cst_14 = arith.constant 0.000000e+00 : f32
    %170 = vector.broadcast %cst_14 : f32 to vector<8x128xf32>
    %171 = arith.maximumf %169, %170 : vector<8x128xf32>
    %c42 = arith.constant 42 : index
    %172 = memref.load %arg1[%c42] : memref<195xf32, #tpu.memory_space<smem>>
    %173 = vector.broadcast %172 : f32 to vector<8x128xf32>
    %174 = arith.mulf %71, %173 : vector<8x128xf32>
    %c43 = arith.constant 43 : index
    %175 = memref.load %arg1[%c43] : memref<195xf32, #tpu.memory_space<smem>>
    %176 = vector.broadcast %175 : f32 to vector<8x128xf32>
    %177 = arith.mulf %91, %176 : vector<8x128xf32>
    %178 = arith.addf %174, %177 : vector<8x128xf32>
    %c44 = arith.constant 44 : index
    %179 = memref.load %arg1[%c44] : memref<195xf32, #tpu.memory_space<smem>>
    %180 = vector.broadcast %179 : f32 to vector<8x128xf32>
    %181 = arith.mulf %111, %180 : vector<8x128xf32>
    %182 = arith.addf %178, %181 : vector<8x128xf32>
    %c45 = arith.constant 45 : index
    %183 = memref.load %arg1[%c45] : memref<195xf32, #tpu.memory_space<smem>>
    %184 = vector.broadcast %183 : f32 to vector<8x128xf32>
    %185 = arith.mulf %131, %184 : vector<8x128xf32>
    %186 = arith.addf %182, %185 : vector<8x128xf32>
    %c46 = arith.constant 46 : index
    %187 = memref.load %arg1[%c46] : memref<195xf32, #tpu.memory_space<smem>>
    %188 = vector.broadcast %187 : f32 to vector<8x128xf32>
    %189 = arith.mulf %151, %188 : vector<8x128xf32>
    %190 = arith.addf %186, %189 : vector<8x128xf32>
    %c47 = arith.constant 47 : index
    %191 = memref.load %arg1[%c47] : memref<195xf32, #tpu.memory_space<smem>>
    %192 = vector.broadcast %191 : f32 to vector<8x128xf32>
    %193 = arith.mulf %171, %192 : vector<8x128xf32>
    %194 = arith.addf %190, %193 : vector<8x128xf32>
    %c102 = arith.constant 102 : index
    %195 = memref.load %arg1[%c102] : memref<195xf32, #tpu.memory_space<smem>>
    %196 = vector.broadcast %195 : f32 to vector<8x128xf32>
    %197 = arith.addf %194, %196 : vector<8x128xf32>
    %cst_15 = arith.constant 0.000000e+00 : f32
    %198 = vector.broadcast %cst_15 : f32 to vector<8x128xf32>
    %199 = arith.maximumf %197, %198 : vector<8x128xf32>
    %c48 = arith.constant 48 : index
    %200 = memref.load %arg1[%c48] : memref<195xf32, #tpu.memory_space<smem>>
    %201 = vector.broadcast %200 : f32 to vector<8x128xf32>
    %202 = arith.mulf %71, %201 : vector<8x128xf32>
    %c49 = arith.constant 49 : index
    %203 = memref.load %arg1[%c49] : memref<195xf32, #tpu.memory_space<smem>>
    %204 = vector.broadcast %203 : f32 to vector<8x128xf32>
    %205 = arith.mulf %91, %204 : vector<8x128xf32>
    %206 = arith.addf %202, %205 : vector<8x128xf32>
    %c50 = arith.constant 50 : index
    %207 = memref.load %arg1[%c50] : memref<195xf32, #tpu.memory_space<smem>>
    %208 = vector.broadcast %207 : f32 to vector<8x128xf32>
    %209 = arith.mulf %111, %208 : vector<8x128xf32>
    %210 = arith.addf %206, %209 : vector<8x128xf32>
    %c51 = arith.constant 51 : index
    %211 = memref.load %arg1[%c51] : memref<195xf32, #tpu.memory_space<smem>>
    %212 = vector.broadcast %211 : f32 to vector<8x128xf32>
    %213 = arith.mulf %131, %212 : vector<8x128xf32>
    %214 = arith.addf %210, %213 : vector<8x128xf32>
    %c52 = arith.constant 52 : index
    %215 = memref.load %arg1[%c52] : memref<195xf32, #tpu.memory_space<smem>>
    %216 = vector.broadcast %215 : f32 to vector<8x128xf32>
    %217 = arith.mulf %151, %216 : vector<8x128xf32>
    %218 = arith.addf %214, %217 : vector<8x128xf32>
    %c53 = arith.constant 53 : index
    %219 = memref.load %arg1[%c53] : memref<195xf32, #tpu.memory_space<smem>>
    %220 = vector.broadcast %219 : f32 to vector<8x128xf32>
    %221 = arith.mulf %171, %220 : vector<8x128xf32>
    %222 = arith.addf %218, %221 : vector<8x128xf32>
    %c103 = arith.constant 103 : index
    %223 = memref.load %arg1[%c103] : memref<195xf32, #tpu.memory_space<smem>>
    %224 = vector.broadcast %223 : f32 to vector<8x128xf32>
    %225 = arith.addf %222, %224 : vector<8x128xf32>
    %cst_16 = arith.constant 0.000000e+00 : f32
    %226 = vector.broadcast %cst_16 : f32 to vector<8x128xf32>
    %227 = arith.maximumf %225, %226 : vector<8x128xf32>
    %c54 = arith.constant 54 : index
    %228 = memref.load %arg1[%c54] : memref<195xf32, #tpu.memory_space<smem>>
    %229 = vector.broadcast %228 : f32 to vector<8x128xf32>
    %230 = arith.mulf %71, %229 : vector<8x128xf32>
    %c55 = arith.constant 55 : index
    %231 = memref.load %arg1[%c55] : memref<195xf32, #tpu.memory_space<smem>>
    %232 = vector.broadcast %231 : f32 to vector<8x128xf32>
    %233 = arith.mulf %91, %232 : vector<8x128xf32>
    %234 = arith.addf %230, %233 : vector<8x128xf32>
    %c56 = arith.constant 56 : index
    %235 = memref.load %arg1[%c56] : memref<195xf32, #tpu.memory_space<smem>>
    %236 = vector.broadcast %235 : f32 to vector<8x128xf32>
    %237 = arith.mulf %111, %236 : vector<8x128xf32>
    %238 = arith.addf %234, %237 : vector<8x128xf32>
    %c57 = arith.constant 57 : index
    %239 = memref.load %arg1[%c57] : memref<195xf32, #tpu.memory_space<smem>>
    %240 = vector.broadcast %239 : f32 to vector<8x128xf32>
    %241 = arith.mulf %131, %240 : vector<8x128xf32>
    %242 = arith.addf %238, %241 : vector<8x128xf32>
    %c58 = arith.constant 58 : index
    %243 = memref.load %arg1[%c58] : memref<195xf32, #tpu.memory_space<smem>>
    %244 = vector.broadcast %243 : f32 to vector<8x128xf32>
    %245 = arith.mulf %151, %244 : vector<8x128xf32>
    %246 = arith.addf %242, %245 : vector<8x128xf32>
    %c59 = arith.constant 59 : index
    %247 = memref.load %arg1[%c59] : memref<195xf32, #tpu.memory_space<smem>>
    %248 = vector.broadcast %247 : f32 to vector<8x128xf32>
    %249 = arith.mulf %171, %248 : vector<8x128xf32>
    %250 = arith.addf %246, %249 : vector<8x128xf32>
    %c104 = arith.constant 104 : index
    %251 = memref.load %arg1[%c104] : memref<195xf32, #tpu.memory_space<smem>>
    %252 = vector.broadcast %251 : f32 to vector<8x128xf32>
    %253 = arith.addf %250, %252 : vector<8x128xf32>
    %cst_17 = arith.constant 0.000000e+00 : f32
    %254 = vector.broadcast %cst_17 : f32 to vector<8x128xf32>
    %255 = arith.maximumf %253, %254 : vector<8x128xf32>
    %c60 = arith.constant 60 : index
    %256 = memref.load %arg1[%c60] : memref<195xf32, #tpu.memory_space<smem>>
    %257 = vector.broadcast %256 : f32 to vector<8x128xf32>
    %258 = arith.mulf %71, %257 : vector<8x128xf32>
    %c61 = arith.constant 61 : index
    %259 = memref.load %arg1[%c61] : memref<195xf32, #tpu.memory_space<smem>>
    %260 = vector.broadcast %259 : f32 to vector<8x128xf32>
    %261 = arith.mulf %91, %260 : vector<8x128xf32>
    %262 = arith.addf %258, %261 : vector<8x128xf32>
    %c62 = arith.constant 62 : index
    %263 = memref.load %arg1[%c62] : memref<195xf32, #tpu.memory_space<smem>>
    %264 = vector.broadcast %263 : f32 to vector<8x128xf32>
    %265 = arith.mulf %111, %264 : vector<8x128xf32>
    %266 = arith.addf %262, %265 : vector<8x128xf32>
    %c63 = arith.constant 63 : index
    %267 = memref.load %arg1[%c63] : memref<195xf32, #tpu.memory_space<smem>>
    %268 = vector.broadcast %267 : f32 to vector<8x128xf32>
    %269 = arith.mulf %131, %268 : vector<8x128xf32>
    %270 = arith.addf %266, %269 : vector<8x128xf32>
    %c64 = arith.constant 64 : index
    %271 = memref.load %arg1[%c64] : memref<195xf32, #tpu.memory_space<smem>>
    %272 = vector.broadcast %271 : f32 to vector<8x128xf32>
    %273 = arith.mulf %151, %272 : vector<8x128xf32>
    %274 = arith.addf %270, %273 : vector<8x128xf32>
    %c65 = arith.constant 65 : index
    %275 = memref.load %arg1[%c65] : memref<195xf32, #tpu.memory_space<smem>>
    %276 = vector.broadcast %275 : f32 to vector<8x128xf32>
    %277 = arith.mulf %171, %276 : vector<8x128xf32>
    %278 = arith.addf %274, %277 : vector<8x128xf32>
    %c105 = arith.constant 105 : index
    %279 = memref.load %arg1[%c105] : memref<195xf32, #tpu.memory_space<smem>>
    %280 = vector.broadcast %279 : f32 to vector<8x128xf32>
    %281 = arith.addf %278, %280 : vector<8x128xf32>
    %cst_18 = arith.constant 0.000000e+00 : f32
    %282 = vector.broadcast %cst_18 : f32 to vector<8x128xf32>
    %283 = arith.maximumf %281, %282 : vector<8x128xf32>
    %c66 = arith.constant 66 : index
    %284 = memref.load %arg1[%c66] : memref<195xf32, #tpu.memory_space<smem>>
    %285 = vector.broadcast %284 : f32 to vector<8x128xf32>
    %286 = arith.mulf %71, %285 : vector<8x128xf32>
    %c67 = arith.constant 67 : index
    %287 = memref.load %arg1[%c67] : memref<195xf32, #tpu.memory_space<smem>>
    %288 = vector.broadcast %287 : f32 to vector<8x128xf32>
    %289 = arith.mulf %91, %288 : vector<8x128xf32>
    %290 = arith.addf %286, %289 : vector<8x128xf32>
    %c68 = arith.constant 68 : index
    %291 = memref.load %arg1[%c68] : memref<195xf32, #tpu.memory_space<smem>>
    %292 = vector.broadcast %291 : f32 to vector<8x128xf32>
    %293 = arith.mulf %111, %292 : vector<8x128xf32>
    %294 = arith.addf %290, %293 : vector<8x128xf32>
    %c69 = arith.constant 69 : index
    %295 = memref.load %arg1[%c69] : memref<195xf32, #tpu.memory_space<smem>>
    %296 = vector.broadcast %295 : f32 to vector<8x128xf32>
    %297 = arith.mulf %131, %296 : vector<8x128xf32>
    %298 = arith.addf %294, %297 : vector<8x128xf32>
    %c70 = arith.constant 70 : index
    %299 = memref.load %arg1[%c70] : memref<195xf32, #tpu.memory_space<smem>>
    %300 = vector.broadcast %299 : f32 to vector<8x128xf32>
    %301 = arith.mulf %151, %300 : vector<8x128xf32>
    %302 = arith.addf %298, %301 : vector<8x128xf32>
    %c71 = arith.constant 71 : index
    %303 = memref.load %arg1[%c71] : memref<195xf32, #tpu.memory_space<smem>>
    %304 = vector.broadcast %303 : f32 to vector<8x128xf32>
    %305 = arith.mulf %171, %304 : vector<8x128xf32>
    %306 = arith.addf %302, %305 : vector<8x128xf32>
    %c106 = arith.constant 106 : index
    %307 = memref.load %arg1[%c106] : memref<195xf32, #tpu.memory_space<smem>>
    %308 = vector.broadcast %307 : f32 to vector<8x128xf32>
    %309 = arith.addf %306, %308 : vector<8x128xf32>
    %cst_19 = arith.constant 0.000000e+00 : f32
    %310 = vector.broadcast %cst_19 : f32 to vector<8x128xf32>
    %311 = arith.maximumf %309, %310 : vector<8x128xf32>
    %c72 = arith.constant 72 : index
    %312 = memref.load %arg1[%c72] : memref<195xf32, #tpu.memory_space<smem>>
    %313 = vector.broadcast %312 : f32 to vector<8x128xf32>
    %314 = arith.mulf %71, %313 : vector<8x128xf32>
    %c73 = arith.constant 73 : index
    %315 = memref.load %arg1[%c73] : memref<195xf32, #tpu.memory_space<smem>>
    %316 = vector.broadcast %315 : f32 to vector<8x128xf32>
    %317 = arith.mulf %91, %316 : vector<8x128xf32>
    %318 = arith.addf %314, %317 : vector<8x128xf32>
    %c74 = arith.constant 74 : index
    %319 = memref.load %arg1[%c74] : memref<195xf32, #tpu.memory_space<smem>>
    %320 = vector.broadcast %319 : f32 to vector<8x128xf32>
    %321 = arith.mulf %111, %320 : vector<8x128xf32>
    %322 = arith.addf %318, %321 : vector<8x128xf32>
    %c75 = arith.constant 75 : index
    %323 = memref.load %arg1[%c75] : memref<195xf32, #tpu.memory_space<smem>>
    %324 = vector.broadcast %323 : f32 to vector<8x128xf32>
    %325 = arith.mulf %131, %324 : vector<8x128xf32>
    %326 = arith.addf %322, %325 : vector<8x128xf32>
    %c76 = arith.constant 76 : index
    %327 = memref.load %arg1[%c76] : memref<195xf32, #tpu.memory_space<smem>>
    %328 = vector.broadcast %327 : f32 to vector<8x128xf32>
    %329 = arith.mulf %151, %328 : vector<8x128xf32>
    %330 = arith.addf %326, %329 : vector<8x128xf32>
    %c77 = arith.constant 77 : index
    %331 = memref.load %arg1[%c77] : memref<195xf32, #tpu.memory_space<smem>>
    %332 = vector.broadcast %331 : f32 to vector<8x128xf32>
    %333 = arith.mulf %171, %332 : vector<8x128xf32>
    %334 = arith.addf %330, %333 : vector<8x128xf32>
    %c107 = arith.constant 107 : index
    %335 = memref.load %arg1[%c107] : memref<195xf32, #tpu.memory_space<smem>>
    %336 = vector.broadcast %335 : f32 to vector<8x128xf32>
    %337 = arith.addf %334, %336 : vector<8x128xf32>
    %cst_20 = arith.constant 0.000000e+00 : f32
    %338 = vector.broadcast %cst_20 : f32 to vector<8x128xf32>
    %339 = arith.maximumf %337, %338 : vector<8x128xf32>
    %c78 = arith.constant 78 : index
    %340 = memref.load %arg1[%c78] : memref<195xf32, #tpu.memory_space<smem>>
    %341 = vector.broadcast %340 : f32 to vector<8x128xf32>
    %342 = arith.mulf %71, %341 : vector<8x128xf32>
    %c79 = arith.constant 79 : index
    %343 = memref.load %arg1[%c79] : memref<195xf32, #tpu.memory_space<smem>>
    %344 = vector.broadcast %343 : f32 to vector<8x128xf32>
    %345 = arith.mulf %91, %344 : vector<8x128xf32>
    %346 = arith.addf %342, %345 : vector<8x128xf32>
    %c80 = arith.constant 80 : index
    %347 = memref.load %arg1[%c80] : memref<195xf32, #tpu.memory_space<smem>>
    %348 = vector.broadcast %347 : f32 to vector<8x128xf32>
    %349 = arith.mulf %111, %348 : vector<8x128xf32>
    %350 = arith.addf %346, %349 : vector<8x128xf32>
    %c81 = arith.constant 81 : index
    %351 = memref.load %arg1[%c81] : memref<195xf32, #tpu.memory_space<smem>>
    %352 = vector.broadcast %351 : f32 to vector<8x128xf32>
    %353 = arith.mulf %131, %352 : vector<8x128xf32>
    %354 = arith.addf %350, %353 : vector<8x128xf32>
    %c82 = arith.constant 82 : index
    %355 = memref.load %arg1[%c82] : memref<195xf32, #tpu.memory_space<smem>>
    %356 = vector.broadcast %355 : f32 to vector<8x128xf32>
    %357 = arith.mulf %151, %356 : vector<8x128xf32>
    %358 = arith.addf %354, %357 : vector<8x128xf32>
    %c83 = arith.constant 83 : index
    %359 = memref.load %arg1[%c83] : memref<195xf32, #tpu.memory_space<smem>>
    %360 = vector.broadcast %359 : f32 to vector<8x128xf32>
    %361 = arith.mulf %171, %360 : vector<8x128xf32>
    %362 = arith.addf %358, %361 : vector<8x128xf32>
    %c108 = arith.constant 108 : index
    %363 = memref.load %arg1[%c108] : memref<195xf32, #tpu.memory_space<smem>>
    %364 = vector.broadcast %363 : f32 to vector<8x128xf32>
    %365 = arith.addf %362, %364 : vector<8x128xf32>
    %cst_21 = arith.constant 0.000000e+00 : f32
    %366 = vector.broadcast %cst_21 : f32 to vector<8x128xf32>
    %367 = arith.maximumf %365, %366 : vector<8x128xf32>
    %c84 = arith.constant 84 : index
    %368 = memref.load %arg1[%c84] : memref<195xf32, #tpu.memory_space<smem>>
    %369 = vector.broadcast %368 : f32 to vector<8x128xf32>
    %370 = arith.mulf %71, %369 : vector<8x128xf32>
    %c85 = arith.constant 85 : index
    %371 = memref.load %arg1[%c85] : memref<195xf32, #tpu.memory_space<smem>>
    %372 = vector.broadcast %371 : f32 to vector<8x128xf32>
    %373 = arith.mulf %91, %372 : vector<8x128xf32>
    %374 = arith.addf %370, %373 : vector<8x128xf32>
    %c86 = arith.constant 86 : index
    %375 = memref.load %arg1[%c86] : memref<195xf32, #tpu.memory_space<smem>>
    %376 = vector.broadcast %375 : f32 to vector<8x128xf32>
    %377 = arith.mulf %111, %376 : vector<8x128xf32>
    %378 = arith.addf %374, %377 : vector<8x128xf32>
    %c87 = arith.constant 87 : index
    %379 = memref.load %arg1[%c87] : memref<195xf32, #tpu.memory_space<smem>>
    %380 = vector.broadcast %379 : f32 to vector<8x128xf32>
    %381 = arith.mulf %131, %380 : vector<8x128xf32>
    %382 = arith.addf %378, %381 : vector<8x128xf32>
    %c88 = arith.constant 88 : index
    %383 = memref.load %arg1[%c88] : memref<195xf32, #tpu.memory_space<smem>>
    %384 = vector.broadcast %383 : f32 to vector<8x128xf32>
    %385 = arith.mulf %151, %384 : vector<8x128xf32>
    %386 = arith.addf %382, %385 : vector<8x128xf32>
    %c89 = arith.constant 89 : index
    %387 = memref.load %arg1[%c89] : memref<195xf32, #tpu.memory_space<smem>>
    %388 = vector.broadcast %387 : f32 to vector<8x128xf32>
    %389 = arith.mulf %171, %388 : vector<8x128xf32>
    %390 = arith.addf %386, %389 : vector<8x128xf32>
    %c109 = arith.constant 109 : index
    %391 = memref.load %arg1[%c109] : memref<195xf32, #tpu.memory_space<smem>>
    %392 = vector.broadcast %391 : f32 to vector<8x128xf32>
    %393 = arith.addf %390, %392 : vector<8x128xf32>
    %cst_22 = arith.constant 0.000000e+00 : f32
    %394 = vector.broadcast %cst_22 : f32 to vector<8x128xf32>
    %395 = arith.maximumf %393, %394 : vector<8x128xf32>
    %c90 = arith.constant 90 : index
    %396 = memref.load %arg1[%c90] : memref<195xf32, #tpu.memory_space<smem>>
    %397 = vector.broadcast %396 : f32 to vector<8x128xf32>
    %398 = arith.mulf %71, %397 : vector<8x128xf32>
    %c91 = arith.constant 91 : index
    %399 = memref.load %arg1[%c91] : memref<195xf32, #tpu.memory_space<smem>>
    %400 = vector.broadcast %399 : f32 to vector<8x128xf32>
    %401 = arith.mulf %91, %400 : vector<8x128xf32>
    %402 = arith.addf %398, %401 : vector<8x128xf32>
    %c92 = arith.constant 92 : index
    %403 = memref.load %arg1[%c92] : memref<195xf32, #tpu.memory_space<smem>>
    %404 = vector.broadcast %403 : f32 to vector<8x128xf32>
    %405 = arith.mulf %111, %404 : vector<8x128xf32>
    %406 = arith.addf %402, %405 : vector<8x128xf32>
    %c93 = arith.constant 93 : index
    %407 = memref.load %arg1[%c93] : memref<195xf32, #tpu.memory_space<smem>>
    %408 = vector.broadcast %407 : f32 to vector<8x128xf32>
    %409 = arith.mulf %131, %408 : vector<8x128xf32>
    %410 = arith.addf %406, %409 : vector<8x128xf32>
    %c94 = arith.constant 94 : index
    %411 = memref.load %arg1[%c94] : memref<195xf32, #tpu.memory_space<smem>>
    %412 = vector.broadcast %411 : f32 to vector<8x128xf32>
    %413 = arith.mulf %151, %412 : vector<8x128xf32>
    %414 = arith.addf %410, %413 : vector<8x128xf32>
    %c95 = arith.constant 95 : index
    %415 = memref.load %arg1[%c95] : memref<195xf32, #tpu.memory_space<smem>>
    %416 = vector.broadcast %415 : f32 to vector<8x128xf32>
    %417 = arith.mulf %171, %416 : vector<8x128xf32>
    %418 = arith.addf %414, %417 : vector<8x128xf32>
    %c110 = arith.constant 110 : index
    %419 = memref.load %arg1[%c110] : memref<195xf32, #tpu.memory_space<smem>>
    %420 = vector.broadcast %419 : f32 to vector<8x128xf32>
    %421 = arith.addf %418, %420 : vector<8x128xf32>
    %cst_23 = arith.constant 0.000000e+00 : f32
    %422 = vector.broadcast %cst_23 : f32 to vector<8x128xf32>
    %423 = arith.maximumf %421, %422 : vector<8x128xf32>
    %c96 = arith.constant 96 : index
    %424 = memref.load %arg1[%c96] : memref<195xf32, #tpu.memory_space<smem>>
    %425 = vector.broadcast %424 : f32 to vector<8x128xf32>
    %426 = arith.mulf %71, %425 : vector<8x128xf32>
    %c97 = arith.constant 97 : index
    %427 = memref.load %arg1[%c97] : memref<195xf32, #tpu.memory_space<smem>>
    %428 = vector.broadcast %427 : f32 to vector<8x128xf32>
    %429 = arith.mulf %91, %428 : vector<8x128xf32>
    %430 = arith.addf %426, %429 : vector<8x128xf32>
    %c98 = arith.constant 98 : index
    %431 = memref.load %arg1[%c98] : memref<195xf32, #tpu.memory_space<smem>>
    %432 = vector.broadcast %431 : f32 to vector<8x128xf32>
    %433 = arith.mulf %111, %432 : vector<8x128xf32>
    %434 = arith.addf %430, %433 : vector<8x128xf32>
    %c99 = arith.constant 99 : index
    %435 = memref.load %arg1[%c99] : memref<195xf32, #tpu.memory_space<smem>>
    %436 = vector.broadcast %435 : f32 to vector<8x128xf32>
    %437 = arith.mulf %131, %436 : vector<8x128xf32>
    %438 = arith.addf %434, %437 : vector<8x128xf32>
    %c100 = arith.constant 100 : index
    %439 = memref.load %arg1[%c100] : memref<195xf32, #tpu.memory_space<smem>>
    %440 = vector.broadcast %439 : f32 to vector<8x128xf32>
    %441 = arith.mulf %151, %440 : vector<8x128xf32>
    %442 = arith.addf %438, %441 : vector<8x128xf32>
    %c101 = arith.constant 101 : index
    %443 = memref.load %arg1[%c101] : memref<195xf32, #tpu.memory_space<smem>>
    %444 = vector.broadcast %443 : f32 to vector<8x128xf32>
    %445 = arith.mulf %171, %444 : vector<8x128xf32>
    %446 = arith.addf %442, %445 : vector<8x128xf32>
    %c111 = arith.constant 111 : index
    %447 = memref.load %arg1[%c111] : memref<195xf32, #tpu.memory_space<smem>>
    %448 = vector.broadcast %447 : f32 to vector<8x128xf32>
    %449 = arith.addf %446, %448 : vector<8x128xf32>
    %cst_24 = arith.constant 0.000000e+00 : f32
    %450 = vector.broadcast %cst_24 : f32 to vector<8x128xf32>
    %451 = arith.maximumf %449, %450 : vector<8x128xf32>
    %c112 = arith.constant 112 : index
    %452 = memref.load %arg1[%c112] : memref<195xf32, #tpu.memory_space<smem>>
    %453 = vector.broadcast %452 : f32 to vector<8x128xf32>
    %454 = arith.mulf %199, %453 : vector<8x128xf32>
    %c113 = arith.constant 113 : index
    %455 = memref.load %arg1[%c113] : memref<195xf32, #tpu.memory_space<smem>>
    %456 = vector.broadcast %455 : f32 to vector<8x128xf32>
    %457 = arith.mulf %227, %456 : vector<8x128xf32>
    %458 = arith.addf %454, %457 : vector<8x128xf32>
    %c114 = arith.constant 114 : index
    %459 = memref.load %arg1[%c114] : memref<195xf32, #tpu.memory_space<smem>>
    %460 = vector.broadcast %459 : f32 to vector<8x128xf32>
    %461 = arith.mulf %255, %460 : vector<8x128xf32>
    %462 = arith.addf %458, %461 : vector<8x128xf32>
    %c115 = arith.constant 115 : index
    %463 = memref.load %arg1[%c115] : memref<195xf32, #tpu.memory_space<smem>>
    %464 = vector.broadcast %463 : f32 to vector<8x128xf32>
    %465 = arith.mulf %283, %464 : vector<8x128xf32>
    %466 = arith.addf %462, %465 : vector<8x128xf32>
    %c116 = arith.constant 116 : index
    %467 = memref.load %arg1[%c116] : memref<195xf32, #tpu.memory_space<smem>>
    %468 = vector.broadcast %467 : f32 to vector<8x128xf32>
    %469 = arith.mulf %311, %468 : vector<8x128xf32>
    %470 = arith.addf %466, %469 : vector<8x128xf32>
    %c117 = arith.constant 117 : index
    %471 = memref.load %arg1[%c117] : memref<195xf32, #tpu.memory_space<smem>>
    %472 = vector.broadcast %471 : f32 to vector<8x128xf32>
    %473 = arith.mulf %339, %472 : vector<8x128xf32>
    %474 = arith.addf %470, %473 : vector<8x128xf32>
    %c118 = arith.constant 118 : index
    %475 = memref.load %arg1[%c118] : memref<195xf32, #tpu.memory_space<smem>>
    %476 = vector.broadcast %475 : f32 to vector<8x128xf32>
    %477 = arith.mulf %367, %476 : vector<8x128xf32>
    %478 = arith.addf %474, %477 : vector<8x128xf32>
    %c119 = arith.constant 119 : index
    %479 = memref.load %arg1[%c119] : memref<195xf32, #tpu.memory_space<smem>>
    %480 = vector.broadcast %479 : f32 to vector<8x128xf32>
    %481 = arith.mulf %395, %480 : vector<8x128xf32>
    %482 = arith.addf %478, %481 : vector<8x128xf32>
    %c120 = arith.constant 120 : index
    %483 = memref.load %arg1[%c120] : memref<195xf32, #tpu.memory_space<smem>>
    %484 = vector.broadcast %483 : f32 to vector<8x128xf32>
    %485 = arith.mulf %423, %484 : vector<8x128xf32>
    %486 = arith.addf %482, %485 : vector<8x128xf32>
    %c121 = arith.constant 121 : index
    %487 = memref.load %arg1[%c121] : memref<195xf32, #tpu.memory_space<smem>>
    %488 = vector.broadcast %487 : f32 to vector<8x128xf32>
    %489 = arith.mulf %451, %488 : vector<8x128xf32>
    %490 = arith.addf %486, %489 : vector<8x128xf32>
    %c172 = arith.constant 172 : index
    %491 = memref.load %arg1[%c172] : memref<195xf32, #tpu.memory_space<smem>>
    %492 = vector.broadcast %491 : f32 to vector<8x128xf32>
    %493 = arith.addf %490, %492 : vector<8x128xf32>
    %cst_25 = arith.constant 0.000000e+00 : f32
    %494 = vector.broadcast %cst_25 : f32 to vector<8x128xf32>
    %495 = arith.maximumf %493, %494 : vector<8x128xf32>
    %c122 = arith.constant 122 : index
    %496 = memref.load %arg1[%c122] : memref<195xf32, #tpu.memory_space<smem>>
    %497 = vector.broadcast %496 : f32 to vector<8x128xf32>
    %498 = arith.mulf %199, %497 : vector<8x128xf32>
    %c123 = arith.constant 123 : index
    %499 = memref.load %arg1[%c123] : memref<195xf32, #tpu.memory_space<smem>>
    %500 = vector.broadcast %499 : f32 to vector<8x128xf32>
    %501 = arith.mulf %227, %500 : vector<8x128xf32>
    %502 = arith.addf %498, %501 : vector<8x128xf32>
    %c124 = arith.constant 124 : index
    %503 = memref.load %arg1[%c124] : memref<195xf32, #tpu.memory_space<smem>>
    %504 = vector.broadcast %503 : f32 to vector<8x128xf32>
    %505 = arith.mulf %255, %504 : vector<8x128xf32>
    %506 = arith.addf %502, %505 : vector<8x128xf32>
    %c125 = arith.constant 125 : index
    %507 = memref.load %arg1[%c125] : memref<195xf32, #tpu.memory_space<smem>>
    %508 = vector.broadcast %507 : f32 to vector<8x128xf32>
    %509 = arith.mulf %283, %508 : vector<8x128xf32>
    %510 = arith.addf %506, %509 : vector<8x128xf32>
    %c126 = arith.constant 126 : index
    %511 = memref.load %arg1[%c126] : memref<195xf32, #tpu.memory_space<smem>>
    %512 = vector.broadcast %511 : f32 to vector<8x128xf32>
    %513 = arith.mulf %311, %512 : vector<8x128xf32>
    %514 = arith.addf %510, %513 : vector<8x128xf32>
    %c127 = arith.constant 127 : index
    %515 = memref.load %arg1[%c127] : memref<195xf32, #tpu.memory_space<smem>>
    %516 = vector.broadcast %515 : f32 to vector<8x128xf32>
    %517 = arith.mulf %339, %516 : vector<8x128xf32>
    %518 = arith.addf %514, %517 : vector<8x128xf32>
    %c128 = arith.constant 128 : index
    %519 = memref.load %arg1[%c128] : memref<195xf32, #tpu.memory_space<smem>>
    %520 = vector.broadcast %519 : f32 to vector<8x128xf32>
    %521 = arith.mulf %367, %520 : vector<8x128xf32>
    %522 = arith.addf %518, %521 : vector<8x128xf32>
    %c129 = arith.constant 129 : index
    %523 = memref.load %arg1[%c129] : memref<195xf32, #tpu.memory_space<smem>>
    %524 = vector.broadcast %523 : f32 to vector<8x128xf32>
    %525 = arith.mulf %395, %524 : vector<8x128xf32>
    %526 = arith.addf %522, %525 : vector<8x128xf32>
    %c130 = arith.constant 130 : index
    %527 = memref.load %arg1[%c130] : memref<195xf32, #tpu.memory_space<smem>>
    %528 = vector.broadcast %527 : f32 to vector<8x128xf32>
    %529 = arith.mulf %423, %528 : vector<8x128xf32>
    %530 = arith.addf %526, %529 : vector<8x128xf32>
    %c131 = arith.constant 131 : index
    %531 = memref.load %arg1[%c131] : memref<195xf32, #tpu.memory_space<smem>>
    %532 = vector.broadcast %531 : f32 to vector<8x128xf32>
    %533 = arith.mulf %451, %532 : vector<8x128xf32>
    %534 = arith.addf %530, %533 : vector<8x128xf32>
    %c173 = arith.constant 173 : index
    %535 = memref.load %arg1[%c173] : memref<195xf32, #tpu.memory_space<smem>>
    %536 = vector.broadcast %535 : f32 to vector<8x128xf32>
    %537 = arith.addf %534, %536 : vector<8x128xf32>
    %cst_26 = arith.constant 0.000000e+00 : f32
    %538 = vector.broadcast %cst_26 : f32 to vector<8x128xf32>
    %539 = arith.maximumf %537, %538 : vector<8x128xf32>
    %c132 = arith.constant 132 : index
    %540 = memref.load %arg1[%c132] : memref<195xf32, #tpu.memory_space<smem>>
    %541 = vector.broadcast %540 : f32 to vector<8x128xf32>
    %542 = arith.mulf %199, %541 : vector<8x128xf32>
    %c133 = arith.constant 133 : index
    %543 = memref.load %arg1[%c133] : memref<195xf32, #tpu.memory_space<smem>>
    %544 = vector.broadcast %543 : f32 to vector<8x128xf32>
    %545 = arith.mulf %227, %544 : vector<8x128xf32>
    %546 = arith.addf %542, %545 : vector<8x128xf32>
    %c134 = arith.constant 134 : index
    %547 = memref.load %arg1[%c134] : memref<195xf32, #tpu.memory_space<smem>>
    %548 = vector.broadcast %547 : f32 to vector<8x128xf32>
    %549 = arith.mulf %255, %548 : vector<8x128xf32>
    %550 = arith.addf %546, %549 : vector<8x128xf32>
    %c135 = arith.constant 135 : index
    %551 = memref.load %arg1[%c135] : memref<195xf32, #tpu.memory_space<smem>>
    %552 = vector.broadcast %551 : f32 to vector<8x128xf32>
    %553 = arith.mulf %283, %552 : vector<8x128xf32>
    %554 = arith.addf %550, %553 : vector<8x128xf32>
    %c136 = arith.constant 136 : index
    %555 = memref.load %arg1[%c136] : memref<195xf32, #tpu.memory_space<smem>>
    %556 = vector.broadcast %555 : f32 to vector<8x128xf32>
    %557 = arith.mulf %311, %556 : vector<8x128xf32>
    %558 = arith.addf %554, %557 : vector<8x128xf32>
    %c137 = arith.constant 137 : index
    %559 = memref.load %arg1[%c137] : memref<195xf32, #tpu.memory_space<smem>>
    %560 = vector.broadcast %559 : f32 to vector<8x128xf32>
    %561 = arith.mulf %339, %560 : vector<8x128xf32>
    %562 = arith.addf %558, %561 : vector<8x128xf32>
    %c138 = arith.constant 138 : index
    %563 = memref.load %arg1[%c138] : memref<195xf32, #tpu.memory_space<smem>>
    %564 = vector.broadcast %563 : f32 to vector<8x128xf32>
    %565 = arith.mulf %367, %564 : vector<8x128xf32>
    %566 = arith.addf %562, %565 : vector<8x128xf32>
    %c139 = arith.constant 139 : index
    %567 = memref.load %arg1[%c139] : memref<195xf32, #tpu.memory_space<smem>>
    %568 = vector.broadcast %567 : f32 to vector<8x128xf32>
    %569 = arith.mulf %395, %568 : vector<8x128xf32>
    %570 = arith.addf %566, %569 : vector<8x128xf32>
    %c140 = arith.constant 140 : index
    %571 = memref.load %arg1[%c140] : memref<195xf32, #tpu.memory_space<smem>>
    %572 = vector.broadcast %571 : f32 to vector<8x128xf32>
    %573 = arith.mulf %423, %572 : vector<8x128xf32>
    %574 = arith.addf %570, %573 : vector<8x128xf32>
    %c141 = arith.constant 141 : index
    %575 = memref.load %arg1[%c141] : memref<195xf32, #tpu.memory_space<smem>>
    %576 = vector.broadcast %575 : f32 to vector<8x128xf32>
    %577 = arith.mulf %451, %576 : vector<8x128xf32>
    %578 = arith.addf %574, %577 : vector<8x128xf32>
    %c174 = arith.constant 174 : index
    %579 = memref.load %arg1[%c174] : memref<195xf32, #tpu.memory_space<smem>>
    %580 = vector.broadcast %579 : f32 to vector<8x128xf32>
    %581 = arith.addf %578, %580 : vector<8x128xf32>
    %cst_27 = arith.constant 0.000000e+00 : f32
    %582 = vector.broadcast %cst_27 : f32 to vector<8x128xf32>
    %583 = arith.maximumf %581, %582 : vector<8x128xf32>
    %c142 = arith.constant 142 : index
    %584 = memref.load %arg1[%c142] : memref<195xf32, #tpu.memory_space<smem>>
    %585 = vector.broadcast %584 : f32 to vector<8x128xf32>
    %586 = arith.mulf %199, %585 : vector<8x128xf32>
    %c143 = arith.constant 143 : index
    %587 = memref.load %arg1[%c143] : memref<195xf32, #tpu.memory_space<smem>>
    %588 = vector.broadcast %587 : f32 to vector<8x128xf32>
    %589 = arith.mulf %227, %588 : vector<8x128xf32>
    %590 = arith.addf %586, %589 : vector<8x128xf32>
    %c144 = arith.constant 144 : index
    %591 = memref.load %arg1[%c144] : memref<195xf32, #tpu.memory_space<smem>>
    %592 = vector.broadcast %591 : f32 to vector<8x128xf32>
    %593 = arith.mulf %255, %592 : vector<8x128xf32>
    %594 = arith.addf %590, %593 : vector<8x128xf32>
    %c145 = arith.constant 145 : index
    %595 = memref.load %arg1[%c145] : memref<195xf32, #tpu.memory_space<smem>>
    %596 = vector.broadcast %595 : f32 to vector<8x128xf32>
    %597 = arith.mulf %283, %596 : vector<8x128xf32>
    %598 = arith.addf %594, %597 : vector<8x128xf32>
    %c146 = arith.constant 146 : index
    %599 = memref.load %arg1[%c146] : memref<195xf32, #tpu.memory_space<smem>>
    %600 = vector.broadcast %599 : f32 to vector<8x128xf32>
    %601 = arith.mulf %311, %600 : vector<8x128xf32>
    %602 = arith.addf %598, %601 : vector<8x128xf32>
    %c147 = arith.constant 147 : index
    %603 = memref.load %arg1[%c147] : memref<195xf32, #tpu.memory_space<smem>>
    %604 = vector.broadcast %603 : f32 to vector<8x128xf32>
    %605 = arith.mulf %339, %604 : vector<8x128xf32>
    %606 = arith.addf %602, %605 : vector<8x128xf32>
    %c148 = arith.constant 148 : index
    %607 = memref.load %arg1[%c148] : memref<195xf32, #tpu.memory_space<smem>>
    %608 = vector.broadcast %607 : f32 to vector<8x128xf32>
    %609 = arith.mulf %367, %608 : vector<8x128xf32>
    %610 = arith.addf %606, %609 : vector<8x128xf32>
    %c149 = arith.constant 149 : index
    %611 = memref.load %arg1[%c149] : memref<195xf32, #tpu.memory_space<smem>>
    %612 = vector.broadcast %611 : f32 to vector<8x128xf32>
    %613 = arith.mulf %395, %612 : vector<8x128xf32>
    %614 = arith.addf %610, %613 : vector<8x128xf32>
    %c150 = arith.constant 150 : index
    %615 = memref.load %arg1[%c150] : memref<195xf32, #tpu.memory_space<smem>>
    %616 = vector.broadcast %615 : f32 to vector<8x128xf32>
    %617 = arith.mulf %423, %616 : vector<8x128xf32>
    %618 = arith.addf %614, %617 : vector<8x128xf32>
    %c151 = arith.constant 151 : index
    %619 = memref.load %arg1[%c151] : memref<195xf32, #tpu.memory_space<smem>>
    %620 = vector.broadcast %619 : f32 to vector<8x128xf32>
    %621 = arith.mulf %451, %620 : vector<8x128xf32>
    %622 = arith.addf %618, %621 : vector<8x128xf32>
    %c175 = arith.constant 175 : index
    %623 = memref.load %arg1[%c175] : memref<195xf32, #tpu.memory_space<smem>>
    %624 = vector.broadcast %623 : f32 to vector<8x128xf32>
    %625 = arith.addf %622, %624 : vector<8x128xf32>
    %cst_28 = arith.constant 0.000000e+00 : f32
    %626 = vector.broadcast %cst_28 : f32 to vector<8x128xf32>
    %627 = arith.maximumf %625, %626 : vector<8x128xf32>
    %c152 = arith.constant 152 : index
    %628 = memref.load %arg1[%c152] : memref<195xf32, #tpu.memory_space<smem>>
    %629 = vector.broadcast %628 : f32 to vector<8x128xf32>
    %630 = arith.mulf %199, %629 : vector<8x128xf32>
    %c153 = arith.constant 153 : index
    %631 = memref.load %arg1[%c153] : memref<195xf32, #tpu.memory_space<smem>>
    %632 = vector.broadcast %631 : f32 to vector<8x128xf32>
    %633 = arith.mulf %227, %632 : vector<8x128xf32>
    %634 = arith.addf %630, %633 : vector<8x128xf32>
    %c154 = arith.constant 154 : index
    %635 = memref.load %arg1[%c154] : memref<195xf32, #tpu.memory_space<smem>>
    %636 = vector.broadcast %635 : f32 to vector<8x128xf32>
    %637 = arith.mulf %255, %636 : vector<8x128xf32>
    %638 = arith.addf %634, %637 : vector<8x128xf32>
    %c155 = arith.constant 155 : index
    %639 = memref.load %arg1[%c155] : memref<195xf32, #tpu.memory_space<smem>>
    %640 = vector.broadcast %639 : f32 to vector<8x128xf32>
    %641 = arith.mulf %283, %640 : vector<8x128xf32>
    %642 = arith.addf %638, %641 : vector<8x128xf32>
    %c156 = arith.constant 156 : index
    %643 = memref.load %arg1[%c156] : memref<195xf32, #tpu.memory_space<smem>>
    %644 = vector.broadcast %643 : f32 to vector<8x128xf32>
    %645 = arith.mulf %311, %644 : vector<8x128xf32>
    %646 = arith.addf %642, %645 : vector<8x128xf32>
    %c157 = arith.constant 157 : index
    %647 = memref.load %arg1[%c157] : memref<195xf32, #tpu.memory_space<smem>>
    %648 = vector.broadcast %647 : f32 to vector<8x128xf32>
    %649 = arith.mulf %339, %648 : vector<8x128xf32>
    %650 = arith.addf %646, %649 : vector<8x128xf32>
    %c158 = arith.constant 158 : index
    %651 = memref.load %arg1[%c158] : memref<195xf32, #tpu.memory_space<smem>>
    %652 = vector.broadcast %651 : f32 to vector<8x128xf32>
    %653 = arith.mulf %367, %652 : vector<8x128xf32>
    %654 = arith.addf %650, %653 : vector<8x128xf32>
    %c159 = arith.constant 159 : index
    %655 = memref.load %arg1[%c159] : memref<195xf32, #tpu.memory_space<smem>>
    %656 = vector.broadcast %655 : f32 to vector<8x128xf32>
    %657 = arith.mulf %395, %656 : vector<8x128xf32>
    %658 = arith.addf %654, %657 : vector<8x128xf32>
    %c160 = arith.constant 160 : index
    %659 = memref.load %arg1[%c160] : memref<195xf32, #tpu.memory_space<smem>>
    %660 = vector.broadcast %659 : f32 to vector<8x128xf32>
    %661 = arith.mulf %423, %660 : vector<8x128xf32>
    %662 = arith.addf %658, %661 : vector<8x128xf32>
    %c161 = arith.constant 161 : index
    %663 = memref.load %arg1[%c161] : memref<195xf32, #tpu.memory_space<smem>>
    %664 = vector.broadcast %663 : f32 to vector<8x128xf32>
    %665 = arith.mulf %451, %664 : vector<8x128xf32>
    %666 = arith.addf %662, %665 : vector<8x128xf32>
    %c176 = arith.constant 176 : index
    %667 = memref.load %arg1[%c176] : memref<195xf32, #tpu.memory_space<smem>>
    %668 = vector.broadcast %667 : f32 to vector<8x128xf32>
    %669 = arith.addf %666, %668 : vector<8x128xf32>
    %cst_29 = arith.constant 0.000000e+00 : f32
    %670 = vector.broadcast %cst_29 : f32 to vector<8x128xf32>
    %671 = arith.maximumf %669, %670 : vector<8x128xf32>
    %c162 = arith.constant 162 : index
    %672 = memref.load %arg1[%c162] : memref<195xf32, #tpu.memory_space<smem>>
    %673 = vector.broadcast %672 : f32 to vector<8x128xf32>
    %674 = arith.mulf %199, %673 : vector<8x128xf32>
    %c163 = arith.constant 163 : index
    %675 = memref.load %arg1[%c163] : memref<195xf32, #tpu.memory_space<smem>>
    %676 = vector.broadcast %675 : f32 to vector<8x128xf32>
    %677 = arith.mulf %227, %676 : vector<8x128xf32>
    %678 = arith.addf %674, %677 : vector<8x128xf32>
    %c164 = arith.constant 164 : index
    %679 = memref.load %arg1[%c164] : memref<195xf32, #tpu.memory_space<smem>>
    %680 = vector.broadcast %679 : f32 to vector<8x128xf32>
    %681 = arith.mulf %255, %680 : vector<8x128xf32>
    %682 = arith.addf %678, %681 : vector<8x128xf32>
    %c165 = arith.constant 165 : index
    %683 = memref.load %arg1[%c165] : memref<195xf32, #tpu.memory_space<smem>>
    %684 = vector.broadcast %683 : f32 to vector<8x128xf32>
    %685 = arith.mulf %283, %684 : vector<8x128xf32>
    %686 = arith.addf %682, %685 : vector<8x128xf32>
    %c166 = arith.constant 166 : index
    %687 = memref.load %arg1[%c166] : memref<195xf32, #tpu.memory_space<smem>>
    %688 = vector.broadcast %687 : f32 to vector<8x128xf32>
    %689 = arith.mulf %311, %688 : vector<8x128xf32>
    %690 = arith.addf %686, %689 : vector<8x128xf32>
    %c167 = arith.constant 167 : index
    %691 = memref.load %arg1[%c167] : memref<195xf32, #tpu.memory_space<smem>>
    %692 = vector.broadcast %691 : f32 to vector<8x128xf32>
    %693 = arith.mulf %339, %692 : vector<8x128xf32>
    %694 = arith.addf %690, %693 : vector<8x128xf32>
    %c168 = arith.constant 168 : index
    %695 = memref.load %arg1[%c168] : memref<195xf32, #tpu.memory_space<smem>>
    %696 = vector.broadcast %695 : f32 to vector<8x128xf32>
    %697 = arith.mulf %367, %696 : vector<8x128xf32>
    %698 = arith.addf %694, %697 : vector<8x128xf32>
    %c169 = arith.constant 169 : index
    %699 = memref.load %arg1[%c169] : memref<195xf32, #tpu.memory_space<smem>>
    %700 = vector.broadcast %699 : f32 to vector<8x128xf32>
    %701 = arith.mulf %395, %700 : vector<8x128xf32>
    %702 = arith.addf %698, %701 : vector<8x128xf32>
    %c170 = arith.constant 170 : index
    %703 = memref.load %arg1[%c170] : memref<195xf32, #tpu.memory_space<smem>>
    %704 = vector.broadcast %703 : f32 to vector<8x128xf32>
    %705 = arith.mulf %423, %704 : vector<8x128xf32>
    %706 = arith.addf %702, %705 : vector<8x128xf32>
    %c171 = arith.constant 171 : index
    %707 = memref.load %arg1[%c171] : memref<195xf32, #tpu.memory_space<smem>>
    %708 = vector.broadcast %707 : f32 to vector<8x128xf32>
    %709 = arith.mulf %451, %708 : vector<8x128xf32>
    %710 = arith.addf %706, %709 : vector<8x128xf32>
    %c177 = arith.constant 177 : index
    %711 = memref.load %arg1[%c177] : memref<195xf32, #tpu.memory_space<smem>>
    %712 = vector.broadcast %711 : f32 to vector<8x128xf32>
    %713 = arith.addf %710, %712 : vector<8x128xf32>
    %cst_30 = arith.constant 0.000000e+00 : f32
    %714 = vector.broadcast %cst_30 : f32 to vector<8x128xf32>
    %715 = arith.maximumf %713, %714 : vector<8x128xf32>
    %c178 = arith.constant 178 : index
    %716 = memref.load %arg1[%c178] : memref<195xf32, #tpu.memory_space<smem>>
    %717 = vector.broadcast %716 : f32 to vector<8x128xf32>
    %718 = arith.mulf %495, %717 : vector<8x128xf32>
    %c179 = arith.constant 179 : index
    %719 = memref.load %arg1[%c179] : memref<195xf32, #tpu.memory_space<smem>>
    %720 = vector.broadcast %719 : f32 to vector<8x128xf32>
    %721 = arith.mulf %539, %720 : vector<8x128xf32>
    %722 = arith.addf %718, %721 : vector<8x128xf32>
    %c180 = arith.constant 180 : index
    %723 = memref.load %arg1[%c180] : memref<195xf32, #tpu.memory_space<smem>>
    %724 = vector.broadcast %723 : f32 to vector<8x128xf32>
    %725 = arith.mulf %583, %724 : vector<8x128xf32>
    %726 = arith.addf %722, %725 : vector<8x128xf32>
    %c181 = arith.constant 181 : index
    %727 = memref.load %arg1[%c181] : memref<195xf32, #tpu.memory_space<smem>>
    %728 = vector.broadcast %727 : f32 to vector<8x128xf32>
    %729 = arith.mulf %627, %728 : vector<8x128xf32>
    %730 = arith.addf %726, %729 : vector<8x128xf32>
    %c182 = arith.constant 182 : index
    %731 = memref.load %arg1[%c182] : memref<195xf32, #tpu.memory_space<smem>>
    %732 = vector.broadcast %731 : f32 to vector<8x128xf32>
    %733 = arith.mulf %671, %732 : vector<8x128xf32>
    %734 = arith.addf %730, %733 : vector<8x128xf32>
    %c183 = arith.constant 183 : index
    %735 = memref.load %arg1[%c183] : memref<195xf32, #tpu.memory_space<smem>>
    %736 = vector.broadcast %735 : f32 to vector<8x128xf32>
    %737 = arith.mulf %715, %736 : vector<8x128xf32>
    %738 = arith.addf %734, %737 : vector<8x128xf32>
    %c190 = arith.constant 190 : index
    %739 = memref.load %arg1[%c190] : memref<195xf32, #tpu.memory_space<smem>>
    %740 = vector.broadcast %739 : f32 to vector<8x128xf32>
    %741 = arith.addf %738, %740 : vector<8x128xf32>
    %cst_31 = arith.constant 0.000000e+00 : f32
    %742 = vector.broadcast %cst_31 : f32 to vector<8x128xf32>
    %743 = arith.maximumf %741, %742 : vector<8x128xf32>
    %c184 = arith.constant 184 : index
    %744 = memref.load %arg1[%c184] : memref<195xf32, #tpu.memory_space<smem>>
    %745 = vector.broadcast %744 : f32 to vector<8x128xf32>
    %746 = arith.mulf %495, %745 : vector<8x128xf32>
    %c185 = arith.constant 185 : index
    %747 = memref.load %arg1[%c185] : memref<195xf32, #tpu.memory_space<smem>>
    %748 = vector.broadcast %747 : f32 to vector<8x128xf32>
    %749 = arith.mulf %539, %748 : vector<8x128xf32>
    %750 = arith.addf %746, %749 : vector<8x128xf32>
    %c186 = arith.constant 186 : index
    %751 = memref.load %arg1[%c186] : memref<195xf32, #tpu.memory_space<smem>>
    %752 = vector.broadcast %751 : f32 to vector<8x128xf32>
    %753 = arith.mulf %583, %752 : vector<8x128xf32>
    %754 = arith.addf %750, %753 : vector<8x128xf32>
    %c187 = arith.constant 187 : index
    %755 = memref.load %arg1[%c187] : memref<195xf32, #tpu.memory_space<smem>>
    %756 = vector.broadcast %755 : f32 to vector<8x128xf32>
    %757 = arith.mulf %627, %756 : vector<8x128xf32>
    %758 = arith.addf %754, %757 : vector<8x128xf32>
    %c188 = arith.constant 188 : index
    %759 = memref.load %arg1[%c188] : memref<195xf32, #tpu.memory_space<smem>>
    %760 = vector.broadcast %759 : f32 to vector<8x128xf32>
    %761 = arith.mulf %671, %760 : vector<8x128xf32>
    %762 = arith.addf %758, %761 : vector<8x128xf32>
    %c189 = arith.constant 189 : index
    %763 = memref.load %arg1[%c189] : memref<195xf32, #tpu.memory_space<smem>>
    %764 = vector.broadcast %763 : f32 to vector<8x128xf32>
    %765 = arith.mulf %715, %764 : vector<8x128xf32>
    %766 = arith.addf %762, %765 : vector<8x128xf32>
    %c191 = arith.constant 191 : index
    %767 = memref.load %arg1[%c191] : memref<195xf32, #tpu.memory_space<smem>>
    %768 = vector.broadcast %767 : f32 to vector<8x128xf32>
    %769 = arith.addf %766, %768 : vector<8x128xf32>
    %cst_32 = arith.constant 0.000000e+00 : f32
    %770 = vector.broadcast %cst_32 : f32 to vector<8x128xf32>
    %771 = arith.maximumf %769, %770 : vector<8x128xf32>
    %c192 = arith.constant 192 : index
    %772 = memref.load %arg1[%c192] : memref<195xf32, #tpu.memory_space<smem>>
    %773 = vector.broadcast %772 : f32 to vector<8x128xf32>
    %774 = arith.mulf %743, %773 : vector<8x128xf32>
    %c193 = arith.constant 193 : index
    %775 = memref.load %arg1[%c193] : memref<195xf32, #tpu.memory_space<smem>>
    %776 = vector.broadcast %775 : f32 to vector<8x128xf32>
    %777 = arith.mulf %771, %776 : vector<8x128xf32>
    %778 = arith.addf %774, %777 : vector<8x128xf32>
    %c194 = arith.constant 194 : index
    %779 = memref.load %arg1[%c194] : memref<195xf32, #tpu.memory_space<smem>>
    %780 = vector.broadcast %779 : f32 to vector<8x128xf32>
    %781 = arith.addf %778, %780 : vector<8x128xf32>
    %c0_33 = arith.constant 0 : index
    %c0_34 = arith.constant 0 : index
    %782 = vector.load %arg3[%c0_33, %c0_34] : memref<8x128xf32, #tpu.memory_space<vmem>>, vector<8x128xf32>
    tpu.vector_store %arg3[%c0_33, %c0_34], %781 {strides = array<i32>} : memref<8x128xf32, #tpu.memory_space<vmem>>, vector<8x128xf32>,
    return
  }
  func.func @transform_0(%arg0: i32) -> i32 {
    %c0_i32 = arith.constant 0 : i32
    %c0_i32_0 = arith.constant 0 : i32
    return %c0_i32 : i32
  }
  func.func @transform_1(%arg0: i32) -> (i32, i32, i32) {
    %c0_i32 = arith.constant 0 : i32
    %c0_i32_0 = arith.constant 0 : i32
    %c0_i32_1 = arith.constant 0 : i32
    return %c0_i32, %arg0, %c0_i32_0 : i32, i32, i32
  }
  func.func @transform_2(%arg0: i32) -> (i32, i32) {
    %c0_i32 = arith.constant 0 : i32
    %c0_i32_0 = arith.constant 0 : i32
    return %arg0, %c0_i32 : i32, i32
  }
}

</mosaic_0001>

<bundles_post_ra>
// kernel: mlp_forward.1
= control target key start
LH: loop header
LB: loop body
LE: loop exit
PB: predicated region body
PF: predicated region fallthrough
CT: control target
= control target key end

     0   :  { %s2117_s0 = inlined_call_operand.vmem [shape: f32[195], index: 0, kind: input, shape index: {}]   ;;  %s2118_s1 = inlined_call_operand.vmem [shape: f32[2,16,128], index: 1, kind: input, shape index: {}]   ;;  %s2119_s2 = inlined_call_operand.vmem [shape: f32[16,128], index: 2, kind: output, shape index: {}]  }
   0x1   :  { %2125 = sst [smem:[#allocation26_spill]] %s2117_s0 }
   0x2   :  { %2126 = sst [smem:[#allocation27_spill]] %s2118_s1 }
   0x3   :  { %2127 = sst [smem:[#allocation28_spill]] %s2119_s2 }
   0x4   :  { %7 = vsyncpa [#allocation3], 0  ;;  %s1322_s9 = smov 0   ;;  %s1324_s10 = smov 0  }
   0x5   :  { %s1326_s11 = smov 0  }
   0x6 LB: > { %2128 = sst [smem:[#allocation6_spill]] %s1300_s10  ;;  %s1335_s12 = sadd.s32 4294967295, %s1304_s11   ;;  %s1304_s11 = sphi %s1326_s11, %s2189_s11   ;;  %s1300_s10 = sphi %s1324_s10, %s2191_s10   ;;  %s1296_s9 = sphi %s1322_s9, %s2190_s9  }
   0x7   : > { %2129 = sst [smem:[#allocation7_spill]] %s1335_s12  ;;  %s1337_s13 = sadd.s32 1, %s1304_s11  }
   0x8   : > { %2130 = sst [smem:[#allocation8_spill]] %s1337_s13  ;;  %s38_s14 = ssub.s32 %s1304_s11, %s1337_s13 }
   0x9   : > { %s41_s15 = sadd.s32 1, %s1300_s10  ;;  %p39_p0 = scmp.eq.s32.totalorder %s38_s14, 0 }
   0xa   : > { %p48_p1 = scmp.ne.s32.totalorder %s1300_s10, %s1296_s9  ;;  %p49_p2 = scmp.eq.s32.totalorder %s1304_s11, 0 }
   0xb   : > { %p1022_p3 = scmp.ge.s32.totalorder %s1304_s11, 1  ;;  %p91_p5 = scmp.lt.s32.totalorder %s1304_s11, 3 }
   0xc   : > { %s1344_s16 = scalar_select %p39_p0, %s1300_s10, %s41_s15  }
   0xd   : > { %p50_p4 = por %p49_p2, %p48_p1  ;;  %p1236_p6 = scmp.eq.s32.totalorder %s1335_s12, 0 }
   0xe   : > { %2131 = sst [smem:[#allocation9_spill]] %s1344_s16  ;;  %p1347_p7 = pnand %p1022_p3, %p91_p5 }
   0xf   : > { %s2133_s0 = sld [smem:[#allocation26_spill]]  ;;  %s1306_s21 = smov [#allocation2]  }
  0x10   : > { %p1232_p8 = pneg %p1347_p7  ;;  %p1024_p10 = scmp.ge.s32.totalorder %s1304_s11, 2 }
  0x12   : > { %p1233_p9 = pnand %p1236_p6, %p1232_p8  ;;  %110 = sbr.rel (%p1024_p10) target bundleno = 35 (0x23), region = 20 }
  0x15   : > { %s103_s20 = sshll.u32 %s2133_s0, 4  ;;  %s104_s20 = int_to_ptr.vmem [resolvable:$true] %s103_s20 }
  0x16   : > { %1235 = dma.vmem_to_smem (!%p1233_p9), %s104_s20, 32, %s1306_s21, [#allocation3]  }
  0x17   : > { %113 = sbr.rel (!%p50_p4) target bundleno = 35 (0x23), region = 24  ;;  %s115_s22 = sand.u32 (%p50_p4), 1, %s1300_s10  }
  0x18   : > { %s1026_s23 = sshll.u32 (%p50_p4), %s1304_s11, 3  ;;  %s1025_s24 = sshll.u32 (%p50_p4), %s115_s22, 4 }
  0x19   : > { %s2134_s1 = sld [smem:[#allocation27_spill]] (%p50_p4)  ;;  %s117_s28 = scalar_lea.vmem (%p50_p4), [#allocation4], %s1025_s24 }
  0x1f   : > { %s119_s27 = scalar_lea.vmem %s2134_s1, %s1026_s23 }
  0x20   : > { %v150_v0 = vld [vmem:[%s119_s27] sm:$0xff]  ;;  %v152_v1 = vld [vmem:[%s119_s27 + $0x10] sm:$0xff] }
  0x21   : > { %151 = vst [vmem:[%s117_s28] sm:$0xff] %v150_v0 }
  0x22   : > { %153 = vst [vmem:[%s117_s28 + $0x8] sm:$0xff] %v152_v1 }
  0x23 PF: > { %162 = sbr.rel (%p1347_p7) target bundleno = 309 (0x135), region = 62 }
  0x28   : > { %1291 = dma.done.wait (%p1236_p6), [#allocation3], 32  }
  0x29   : > { %1293 = vsyncadd (%p1236_p6), [#allocation3], 4294967264  ;;  %s170_s29 = sand.u32 1, %s1296_s9  }
  0x2a   : > { %s1369_s30 = sshll.u32 %s170_s29, 4 }
  0x2b   : > { %176 = sfence }
  0x2c   : > { %s1372_s4 = sld [smem:[#allocation2]] }
  0x2d   : > { %s1374_s5 = sld [smem:[#allocation2 + $0x1]] }
  0x2e   : > { %s1376_s6 = sld [smem:[#allocation2 + $0x8]] }
  0x2f   : > { %s1378_s7 = sld [smem:[#allocation2 + $0x2]] }
  0x30   : > { %s1380_s8 = sld [smem:[#allocation2 + $0x3]] }
  0x31   : > { %s1382_s11 = sld [smem:[#allocation2 + $0x9]] }
  0x32   : > { %s1384_s14 = sld [smem:[#allocation2 + $0x4]]  ;;  %v199_v4 = vstv %s1372_s4 }
  0x33   : > { %s1386_s9 = sld [smem:[#allocation2 + $0x5]]  ;;  %v202_v5 = vstv %s1374_s5 }
  0x34   : > { %s1388_s15 = sld [smem:[#allocation2 + $0xa]]  ;;  %v206_v18 = vstv %s1376_s6 }
  0x35   : > { %s1390_s17 = sld [smem:[#allocation2 + $0x6]]  ;;  %v210_v6 = vstv %s1378_s7 }
  0x36   : > { %s1392_s18 = sld [smem:[#allocation2 + $0x7]]  ;;  %v213_v7 = vstv %s1380_s8 }
  0x37   : > { %s1394_s19 = sld [smem:[#allocation2 + $0xb]]  ;;  %v217_v19 = vstv %s1382_s11 }
  0x38   : > { %s1396_s20 = sld [smem:[#allocation2 + $0xc]]  ;;  %v221_v12 = vstv %s1384_s14 }
  0x39   : > { %s1398_s21 = sld [smem:[#allocation2 + $0xd]]  ;;  %v224_v13 = vstv %s1386_s9 }
  0x3a   : > { %s1400_s22 = sld [smem:[#allocation2 + $0xe]]  ;;  %v228_v25 = vstv %s1388_s15 }
  0x3b   : > { %s1402_s23 = sld [smem:[#allocation2 + $0xf]]  ;;  %v232_v20 = vstv %s1390_s17 }
  0x3c   : > { %s1404_s24 = sld [smem:[#allocation2 + $0x24]]  ;;  %v235_v21 = vstv %s1392_s18 }
  0x3d   : > { %s1406_s25 = sld [smem:[#allocation2 + $0x10]]  ;;  %v239_v34 = vstv %s1394_s19 }
  0x3e   : > { %s1408_s26 = sld [smem:[#allocation2 + $0x11]]  ;;  %v243_v32 = vstv %s1396_s20 }
  0x3f   : > { %s1410_s27 = sld [smem:[#allocation2 + $0x12]]  ;;  %v246_v33 = vstv %s1398_s21 }
  0x40   : > { %s1412_s28 = sld [smem:[#allocation2 + $0x13]]  ;;  %v250_v39 = vstv %s1400_s22 }
  0x41   : > { %s1414_s29 = sld [smem:[#allocation2 + $0x25]]  ;;  %v254_v49 = vstv %s1402_s23 }
  0x42   : > { %2135 = sst [smem:[#allocation10_spill]] %s1404_s24 }
  0x43   : > { %s1416_s3 = sld [smem:[#allocation2 + $0x14]]  ;;  %v262_v40 = vstv %s1406_s25 }
  0x44   : > { %s1418_s0 = sld [smem:[#allocation2 + $0x15]]  ;;  %v265_v41 = vstv %s1408_s26 }
  0x45   : > { %2136 = sst [smem:[#allocation11_spill]] %s1410_s27 }
  0x46   : > { %2137 = sst [smem:[#allocation12_spill]] %s1412_s28 }
  0x47   : > { %2138 = sst [smem:[#allocation13_spill]] %s1414_s29 }
  0x48   : > { %s1420_s1 = sld [smem:[#allocation2 + $0x16]] }
  0x49   : > { %s1422_s16 = sld [smem:[#allocation2 + $0x17]]  ;;  %v281_v42 = vstv %s1416_s3 }
  0x4a   : > { %s1424_s10 = sld [smem:[#allocation2 + $0x26]]  ;;  %v284_v43 = vstv %s1418_s0 }
  0x4b   : > { %s1426_s13 = sld [smem:[#allocation2 + $0x18]] }
  0x4c   : > { %s1428_s2 = sld [smem:[#allocation2 + $0x19]] }
  0x4d   : > { %s1430_s12 = sld [smem:[#allocation2 + $0x1a]] }
  0x4e   : > { %2139 = sst [smem:[#allocation14_spill]] %s1420_s1  ;;  %s2145_s1 = scalar_lea.vmem [#allocation4], %s1369_s30 }
  0x4f   : > { %2140 = sst [smem:[#allocation15_spill]] %s1422_s16  ;;  %v195_v2 = vld [vmem:[%s2145_s1] sm:$0xff]  ;;  %s2146_s16 = smov %s2145_s1 }
  0x50   : > { %2141 = sst [smem:[#allocation16_spill]] %s1424_s10  ;;  %v1031_v3 = vld [vmem:[%s2146_s16 + $0x8] sm:$0xff]  ;;  %v200_v8 = vmul.f32 %v199_v4, %v195_v2  ;;  %v211_v10 = vmul.f32 %v210_v6, %v195_v2  ;;  %v222_v16 = vmul.f32 %v221_v12, %v195_v2  ;;  %v233_v26 = vmul.f32 %v232_v20, %v195_v2 }
  0x51   : > { %s1432_s29 = sld [smem:[#allocation2 + $0x1b]]  ;;  %v203_v9 = vmul.f32 %v1031_v3, %v202_v5  ;;  %v214_v11 = vmul.f32 %v1031_v3, %v213_v7  ;;  %v225_v17 = vmul.f32 %v1031_v3, %v224_v13  ;;  %v236_v27 = vmul.f32 %v1031_v3, %v235_v21 }
  0x52   : > { %s1434_s24 = sld [smem:[#allocation2 + $0x27]]  ;;  %v300_v53 = vstv %s1426_s13  ;;  %v303_v54 = vstv %s1428_s2 }
  0x53   : > { %2142 = sst [smem:[#allocation17_spill]] %s1430_s12  ;;  %v204_v14 = vadd.f32 %v203_v9, %v200_v8  ;;  %v215_v15 = vadd.f32 %v214_v11, %v211_v10  ;;  %v226_v24 = vadd.f32 %v225_v17, %v222_v16  ;;  %v237_v31 = vadd.f32 %v236_v27, %v233_v26 }
  0x54   : > { %s1436_s28 = sld [smem:[#allocation2 + $0x1c]] }
  0x55   : > { %s1438_s27 = sld [smem:[#allocation2 + $0x1d]]  ;;  %v207_v22 = vadd.f32 %v206_v18, %v204_v14  ;;  %v218_v23 = vadd.f32 %v217_v19, %v215_v15  ;;  %v229_v30 = vadd.f32 %v228_v25, %v226_v24  ;;  %v240_v38 = vadd.f32 %v239_v34, %v237_v31 }
  0x56   : > { %s1444_s10 = sld [smem:[#allocation2 + $0x1e]] }
  0x57   : > { %2143 = sst [smem:[#allocation18_spill]] %s1432_s29  ;;  %v1487_v28 = vmax.f32 %v207_v22, 0.0  ;;  %v1489_v29 = vmax.f32 %v218_v23, 0.0  ;;  %v1502_v35 = vmax.f32 %v229_v30, 0.0  ;;  %v1524_v48 = vmax.f32 %v240_v38, 0.0 }
  0x58   : > { %2144 = sst [smem:[#allocation19_spill]] %s1434_s24 }
  0x59   : > { %s1450_s12 = sld [smem:[#allocation2 + $0x1f]]  ;;  %v244_v36 = vmul.f32 %v243_v32, %v1487_v28  ;;  %v247_v37 = vmul.f32 %v246_v33, %v1489_v29  ;;  %v251_v45 = vmul.f32 %v250_v39, %v1502_v35  ;;  %v263_v46 = vmul.f32 %v262_v40, %v1487_v28 }
  0x5a   : > { %s1452_s29 = sld [smem:[#allocation2 + $0x28]]  ;;  %v266_v47 = vmul.f32 %v265_v41, %v1489_v29  ;;  %v282_v51 = vmul.f32 %v281_v42, %v1487_v28  ;;  %v285_v52 = vmul.f32 %v284_v43, %v1489_v29  ;;  %v255_v59 = vmul.f32 %v254_v49, %v1524_v48 }
  0x5b   : > { %s1454_s24 = sld [smem:[#allocation2 + $0x20]]  ;;  %v248_v44 = vadd.f32 %v247_v37, %v244_v36  ;;  %v301_v61 = vmul.f32 %v300_v53, %v1487_v28  ;;  %v304_v62 = vmul.f32 %v303_v54, %v1489_v29  ;;  %v319_v3 = vstv %s1436_s28 }
  0x5c   : > { %s1456_s1 = sld [smem:[#allocation2 + $0x21]]  ;;  %v267_v57 = vadd.f32 %v266_v47, %v263_v46  ;;  %v286_v63 = vadd.f32 %v285_v52, %v282_v51  ;;  %v322_v4 = vstv %s1438_s27  ;;  %v320_v13 = vmul.f32 %v319_v3, %v1487_v28 }
  0x5d   : > { %s1460_s16 = sld [smem:[#allocation2 + $0x22]]  ;;  %v252_v56 = vadd.f32 %v251_v45, %v248_v44  ;;  %v305_v9 = vadd.f32 %v304_v62, %v301_v61  ;;  %v323_v14 = vmul.f32 %v322_v4, %v1489_v29  ;;  %v326_v16 = vstv %s1444_s10 }
  0x5e   : > { %s1462_s30 = sld [smem:[#allocation2 + $0x23]]  ;;  %v327_v26 = vmul.f32 %v326_v16, %v1502_v35 }
  0x5f   : > { %s1464_s4 = sld [smem:[#allocation2 + $0x29]]  ;;  %v256_v7 = vadd.f32 %v255_v59, %v252_v56  ;;  %v324_v25 = vadd.f32 %v323_v14, %v320_v13  ;;  %v330_v30 = vstv %s1450_s12 }
  0x60   : > { %s1466_s5 = sld [smem:[#allocation2 + $0x2a]]  ;;  %v334_v51 = vstv %s1452_s29 }
  0x61   : > { %s1470_s7 = sld [smem:[#allocation2 + $0x2b]]  ;;  %v338_v18 = vstv %s1454_s24  ;;  %v328_v39 = vadd.f32 %v327_v26, %v324_v25 }
  0x62   : > { %s1474_s8 = sld [smem:[#allocation2 + $0x2c]]  ;;  %v341_v19 = vstv %s1456_s1  ;;  %v339_v31 = vmul.f32 %v338_v18, %v1487_v28  ;;  %v331_v28 = vmul.f32 %v330_v30, %v1524_v48 }
  0x63   : > { %s1476_s14 = sld [smem:[#allocation2 + $0x2d]]  ;;  %v342_v32 = vmul.f32 %v341_v19, %v1489_v29  ;;  %v345_v34 = vstv %s1460_s16 }
  0x64   : > { %s1478_s9 = sld [smem:[#allocation2 + $0x2e]]  ;;  %v346_v41 = vmul.f32 %v345_v34, %v1502_v35  ;;  %v349_v42 = vstv %s1462_s30 }
  0x65   : > { %s1481_s6 = sld [smem:[#allocation2 + $0x2f]]  ;;  %v343_v40 = vadd.f32 %v342_v32, %v339_v31  ;;  %v350_v52 = vmul.f32 %v349_v42, %v1524_v48  ;;  %v353_v61 = vstv %s1464_s4 }
  0x66   : > { %s1483_s11 = sld [smem:[#allocation2 + $0x66]]  ;;  %v357_v44 = vstv %s1466_s5 }
  0x67   : > { %s1485_s17 = sld [smem:[#allocation2 + $0x30]]  ;;  %v360_v46 = vstv %s1470_s7  ;;  %v347_v53 = vadd.f32 %v346_v41, %v343_v40 }
  0x68   : > { %s1491_s18 = sld [smem:[#allocation2 + $0x31]] }
  0x69   : > { %s1495_s15 = sld [smem:[#allocation2 + $0x32]]  ;;  %v351_v4 = vadd.f32 %v350_v52, %v347_v53 }
  0x6a   : > { %2147 = sst [smem:[#allocation20_spill]] %s1478_s9 }
  0x6b   : > { %2148 = sst [smem:[#allocation21_spill]] %s1481_s6  ;;  %v354_v19 = vadd.f32 %v353_v61, %v351_v4 }
  0x6c   : > { %2149 = sst [smem:[#allocation22_spill]] %s1483_s11 }
  0x6d   : > { %s1498_s11 = sld [smem:[#allocation2 + $0x33]]  ;;  %v384_v47 = vstv %s1485_s17 }
  0x6e   : > { %s1500_s6 = sld [smem:[#allocation2 + $0x34]]  ;;  %v387_v49 = vstv %s1491_s18 }
  0x6f   : > { %s1506_s9 = sld [smem:[#allocation2 + $0x35]]  ;;  %v391_v62 = vstv %s1495_s15 }
  0x70   : > { %s2153_s20 = sld [smem:[#allocation11_spill]] }
  0x71   : > { %s1511_s21 = sld [smem:[#allocation2 + $0x67]] }
  0x72   : > { %s1513_s19 = sld [smem:[#allocation2 + $0x36]] }
  0x73   : > { %2150 = sst [smem:[#allocation23_spill]] %s1498_s11 }
  0x74   : > { %2151 = sst [smem:[#allocation24_spill]] %s1500_s6 }
  0x75   : > { %2152 = sst [smem:[#allocation25_spill]] %s1506_s9 }
  0x76   : > { %s2155_s6 = sld [smem:[#allocation14_spill]]  ;;  %v269_v50 = vstv %s2153_s20 }
  0x77   : > { %2154 = sst [smem:[#allocation11_spill]] %s1511_s21  ;;  %v270_v58 = vmul.f32 %v269_v50, %v1502_v35 }
  0x78   : > { %s1517_s11 = sld [smem:[#allocation2 + $0x37]] }
  0x79   : > { %s1522_s22 = sld [smem:[#allocation2 + $0x38]]  ;;  %v271_v5 = vadd.f32 %v270_v58, %v267_v57  ;;  %v364_v58 = vstv %s1474_s8 }
  0x7a   : > { %s2156_s25 = sld [smem:[#allocation12_spill]] }
  0x7b   : > { %s1528_s26 = sld [smem:[#allocation2 + $0x39]] }
  0x7c   : > { %s2157_s0 = sld [smem:[#allocation15_spill]]  ;;  %v288_v55 = vstv %s2155_s6 }
  0x7d   : > { %s2158_s3 = sld [smem:[#allocation17_spill]]  ;;  %v289_v0 = vmul.f32 %v288_v55, %v1502_v35  ;;  %v411_v55 = vstv %s1513_s19 }
  0x7e   : > { %s1534_s21 = sld [smem:[#allocation2 + $0x3a]]  ;;  %v414_v56 = vstv %s1517_s11 }
  0x7f   : > { %s1537_s9 = sld [smem:[#allocation2 + $0x3b]]  ;;  %v290_v11 = vadd.f32 %v289_v0, %v286_v63 }
  0x80   : > { %s1540_s23 = sld [smem:[#allocation2 + $0x68]]  ;;  %v273_v60 = vstv %s2156_s25 }
  0x81   : > { %s1546_s2 = sld [smem:[#allocation2 + $0x3c]]  ;;  %v274_v6 = vmul.f32 %v273_v60, %v1524_v48  ;;  %v422_v16 = vstv %s1528_s26 }
  0x82   : > { %s2162_s13 = sld [smem:[#allocation18_spill]]  ;;  %v292_v1 = vstv %s2157_s0 }
  0x83   : > { %v307_v2 = vstv %s2158_s3  ;;  %s1551_s6 = sld [smem:[#allocation2 + $0x3d]]  ;;  %v293_v8 = vmul.f32 %v292_v1, %v1524_v48  ;;  %v275_v17 = vadd.f32 %v274_v6, %v271_v5  ;;  %v418_v6 = vstv %s1522_s22 }
  0x84   : > { %2159 = sst [smem:[#allocation14_spill]] %s1534_s21  ;;  %v308_v10 = vmul.f32 %v307_v2, %v1502_v35  ;;  %v332_v35 = vadd.f32 %v331_v28, %v328_v39 }
  0x85   : > { %2160 = sst [smem:[#allocation12_spill]] %s1537_s9  ;;  %v294_v24 = vadd.f32 %v293_v8, %v290_v11  ;;  %v368_v8 = vstv %s1476_s14 }
  0x86   : > { %2161 = sst [smem:[#allocation15_spill]] %s1540_s23  ;;  %v309_v21 = vadd.f32 %v308_v10, %v305_v9  ;;  %v335_v3 = vadd.f32 %v334_v51, %v332_v35 }
  0x87   : > { %s2163_s20 = sld [smem:[#allocation10_spill]]  ;;  %v438_v1 = vstv %s1546_s2 }
  0x88   : > { %s1555_s23 = sld [smem:[#allocation2 + $0x3e]]  ;;  %v311_v12 = vstv %s2162_s13  ;;  %v1662_v18 = vmax.f32 %v335_v3, 0.0 }
  0x89   : > { %s1558_s25 = sld [smem:[#allocation2 + $0x3f]]  ;;  %v312_v22 = vmul.f32 %v311_v12, %v1524_v48  ;;  %v441_v2 = vstv %s1551_s6 }
  0x8a   : > { %s2164_s0 = sld [smem:[#allocation13_spill]] }
  0x8b   : > { %s1562_s28 = sld [smem:[#allocation2 + $0x40]]  ;;  %v313_v36 = vadd.f32 %v312_v22, %v309_v21 }
  0x8c   : > { %s1567_s27 = sld [smem:[#allocation2 + $0x41]] }
  0x8d   : > { %v258_v15 = vstv %s2163_s20  ;;  %s2166_s3 = sld [smem:[#allocation16_spill]] }
  0x8e   : > { %s1571_s9 = sld [smem:[#allocation2 + $0x69]]  ;;  %v259_v23 = vadd.f32 %v258_v15, %v256_v7 }
  0x8f   : > { %s1575_s21 = sld [smem:[#allocation2 + $0x42]]  ;;  %v449_v32 = vstv %s1558_s25 }
  0x90   : > { %v277_v20 = vstv %s2164_s0  ;;  %s1579_s13 = sld [smem:[#allocation2 + $0x43]]  ;;  %v1599_v29 = vmax.f32 %v259_v23, 0.0 }
  0x91   : > { %s1582_s10 = sld [smem:[#allocation2 + $0x44]]  ;;  %v278_v33 = vadd.f32 %v277_v20, %v275_v17  ;;  %v445_v17 = vstv %s1555_s23  ;;  %v453_v51 = vstv %s1562_s28 }
  0x92   : > { %2165 = sst [smem:[#allocation17_spill]] %s1567_s27  ;;  %v358_v54 = vmul.f32 %v357_v44, %v1599_v29  ;;  %v385_v59 = vmul.f32 %v384_v47, %v1599_v29  ;;  %v412_v63 = vmul.f32 %v411_v55, %v1599_v29  ;;  %v439_v12 = vmul.f32 %v438_v1, %v1599_v29 }
  0x93   : > { %s2167_s27 = sld [smem:[#allocation19_spill]]  ;;  %v296_v27 = vstv %s2166_s3  ;;  %v1605_v43 = vmax.f32 %v278_v33, 0.0 }
  0x94   : > { %s1588_s24 = sld [smem:[#allocation2 + $0x45]]  ;;  %v297_v37 = vadd.f32 %v296_v27, %v294_v24 }
  0x95   : > { %s1591_s1 = sld [smem:[#allocation2 + $0x46]]  ;;  %v361_v57 = vmul.f32 %v360_v46, %v1605_v43  ;;  %v388_v60 = vmul.f32 %v387_v49, %v1605_v43  ;;  %v415_v0 = vmul.f32 %v414_v56, %v1605_v43  ;;  %v442_v13 = vmul.f32 %v441_v2, %v1605_v43 }
  0x96   : > { %s1593_s20 = sld [smem:[#allocation2 + $0x47]]  ;;  %v1615_v50 = vmax.f32 %v297_v37, 0.0  ;;  %v465_v33 = vstv %s1575_s21  ;;  %v468_v34 = vstv %s1579_s13 }
  0x97   : > { %s1597_s12 = sld [smem:[#allocation2 + $0x6a]]  ;;  %v362_v7 = vadd.f32 %v361_v57, %v358_v54  ;;  %v389_v9 = vadd.f32 %v388_v60, %v385_v59  ;;  %v416_v14 = vadd.f32 %v415_v0, %v412_v63  ;;  %v443_v27 = vadd.f32 %v442_v13, %v439_v12 }
  0x98   : > { %s1603_s16 = sld [smem:[#allocation2 + $0x48]]  ;;  %v365_v5 = vmul.f32 %v364_v58, %v1615_v50  ;;  %v392_v10 = vmul.f32 %v391_v62, %v1615_v50  ;;  %v419_v15 = vmul.f32 %v418_v6, %v1615_v50  ;;  %v446_v30 = vmul.f32 %v445_v17, %v1615_v50 }
  0x99   : > { %v315_v38 = vstv %s2167_s27  ;;  %s1608_s0 = sld [smem:[#allocation2 + $0x49]]  ;;  %v466_v46 = vmul.f32 %v465_v33, %v1599_v29  ;;  %v469_v47 = vmul.f32 %v468_v34, %v1605_v43  ;;  %v472_v52 = vstv %s1582_s10 }
  0x9a   : > { %v316_v45 = vadd.f32 %v315_v38, %v313_v36  ;;  %s1613_s27 = sld [smem:[#allocation2 + $0x4a]]  ;;  %v366_v21 = vadd.f32 %v365_v5, %v362_v7  ;;  %v393_v23 = vadd.f32 %v392_v10, %v389_v9  ;;  %v420_v31 = vadd.f32 %v419_v15, %v416_v14 }
  0x9b   : > { %s1619_s30 = sld [smem:[#allocation2 + $0x4b]]  ;;  %v1681_v36 = vmax.f32 %v354_v19, 0.0  ;;  %v447_v44 = vadd.f32 %v446_v30, %v443_v27  ;;  %v454_v59 = vmul.f32 %v453_v51, %v1662_v18  ;;  %v470_v60 = vadd.f32 %v469_v47, %v466_v46 }
  0x9c   : > { %s1624_s5 = sld [smem:[#allocation2 + $0x4c]]  ;;  %v1632_v48 = vmax.f32 %v316_v45, 0.0  ;;  %v473_v61 = vmul.f32 %v472_v52, %v1615_v50  ;;  %v476_v1 = vstv %s1588_s24 }
  0x9d   : > { %s1630_s29 = sld [smem:[#allocation2 + $0x4d]]  ;;  %v488_v47 = vstv %s1597_s12 }
  0x9e   : > { %s1636_s7 = sld [smem:[#allocation2 + $0x6b]]  ;;  %v369_v20 = vmul.f32 %v368_v8, %v1632_v48  ;;  %v423_v26 = vmul.f32 %v422_v16, %v1632_v48  ;;  %v450_v45 = vmul.f32 %v449_v32, %v1632_v48  ;;  %v474_v8 = vadd.f32 %v473_v61, %v470_v60 }
  0x9f   : > { %s2168_s11 = sld [smem:[#allocation23_spill]]  ;;  %v477_v9 = vmul.f32 %v476_v1, %v1632_v48  ;;  %v492_v13 = vstv %s1603_s16  ;;  %v495_v14 = vstv %s1608_s0 }
  0xa0   : > { %s1642_s8 = sld [smem:[#allocation2 + $0x4e]]  ;;  %v370_v28 = vadd.f32 %v369_v20, %v366_v21  ;;  %v424_v49 = vadd.f32 %v423_v26, %v420_v31  ;;  %v451_v58 = vadd.f32 %v450_v45, %v447_v44  ;;  %v493_v26 = vmul.f32 %v492_v13, %v1599_v29 }
  0xa1   : > { %s1646_s4 = sld [smem:[#allocation2 + $0x4f]]  ;;  %v478_v21 = vadd.f32 %v477_v9, %v474_v8  ;;  %v496_v27 = vmul.f32 %v495_v14, %v1605_v43  ;;  %v499_v30 = vstv %s1613_s27  ;;  %v503_v46 = vstv %s1619_s30 }
  0xa2   : > { %s2169_s17 = sld [smem:[#allocation20_spill]]  ;;  %v455_v6 = vadd.f32 %v454_v59, %v451_v58  ;;  %v500_v45 = vmul.f32 %v499_v30, %v1615_v50  ;;  %v504_v58 = vmul.f32 %v503_v46, %v1632_v48 }
  0xa3   : > { %s1650_s18 = sld [smem:[#allocation2 + $0x50]]  ;;  %v497_v44 = vadd.f32 %v496_v27, %v493_v26  ;;  %v511_v52 = vstv %s1630_s29 }
  0xa4   : > { %s2170_s15 = sld [smem:[#allocation24_spill]]  ;;  %v515_v8 = vstv %s1636_s7 }
  0xa5   : > { %v395_v11 = vstv %s2168_s11  ;;  %s1655_s19 = sld [smem:[#allocation2 + $0x51]]  ;;  %v501_v60 = vadd.f32 %v500_v45, %v497_v44 }
  0xa6   : > { %s1660_s14 = sld [smem:[#allocation2 + $0x52]]  ;;  %v396_v24 = vmul.f32 %v395_v11, %v1632_v48  ;;  %v480_v11 = vstv %s1591_s1  ;;  %v519_v17 = vstv %s1642_s8 }
  0xa7   : > { %s1665_s22 = sld [smem:[#allocation2 + $0x53]]  ;;  %v522_v19 = vstv %s1646_s4  ;;  %v520_v31 = vmul.f32 %v519_v17, %v1599_v29 }
  0xa8   : > { %v372_v22 = vstv %s2169_s17  ;;  %s2171_s2 = sld [smem:[#allocation21_spill]]  ;;  %v397_v40 = vadd.f32 %v396_v24, %v393_v23  ;;  %v484_v23 = vstv %s1593_s20  ;;  %v523_v32 = vmul.f32 %v522_v19, %v1605_v43 }
  0xa9   : > { %s2172_s6 = sld [smem:[#allocation14_spill]]  ;;  %v373_v37 = vmul.f32 %v372_v22, %v1662_v18  ;;  %v481_v22 = vmul.f32 %v480_v11, %v1662_v18 }
  0xaa   : > { %s1669_s26 = sld [smem:[#allocation2 + $0x6c]]  ;;  %v399_v25 = vstv %s2170_s15 }
  0xab   : > { %s2174_s23 = sld [smem:[#allocation25_spill]]  ;;  %v400_v41 = vmul.f32 %v399_v25, %v1662_v18  ;;  %v374_v54 = vadd.f32 %v373_v37, %v370_v28  ;;  %v461_v25 = vstv %s1571_s9  ;;  %v485_v37 = vmul.f32 %v484_v23, %v1681_v36 }
  0xac   : > { %s1674_s3 = sld [smem:[#allocation2 + $0x54]]  ;;  %v482_v28 = vadd.f32 %v481_v22, %v478_v21 }
  0xad   : > { %s1679_s11 = sld [smem:[#allocation2 + $0x55]]  ;;  %v401_v56 = vadd.f32 %v400_v41, %v397_v40  ;;  %v538_v14 = vstv %s1665_s22 }
  0xae   : > { %v376_v38 = vstv %s2171_s2  ;;  %s1686_s17 = sld [smem:[#allocation2 + $0x56]] }
  0xaf   : > { %v426_v39 = vstv %s2172_s6  ;;  %s2175_s15 = sld [smem:[#allocation12_spill]]  ;;  %v377_v55 = vmul.f32 %v376_v38, %v1681_v36  ;;  %v526_v38 = vstv %s1650_s18 }
  0xb0   : > { %2173 = sst [smem:[#allocation18_spill]] %s1669_s26  ;;  %v427_v35 = vmul.f32 %v426_v39, %v1662_v18  ;;  %v527_v51 = vmul.f32 %v526_v38, %v1615_v50 }
  0xb1   : > { %v403_v42 = vstv %s2174_s23  ;;  %s1690_s21 = sld [smem:[#allocation2 + $0x57]]  ;;  %v378_v2 = vadd.f32 %v377_v55, %v374_v54 }
  0xb2   : > { %s1695_s25 = sld [smem:[#allocation2 + $0x58]]  ;;  %v404_v57 = vmul.f32 %v403_v42, %v1681_v36  ;;  %v428_v62 = vadd.f32 %v427_v35, %v424_v49  ;;  %v546_v40 = vstv %s1674_s3  ;;  %v507_v49 = vstv %s1624_s5 }
  0xb3   : > { %s2177_s13 = sld [smem:[#allocation17_spill]]  ;;  %v549_v41 = vstv %s1679_s11  ;;  %v524_v35 = vadd.f32 %v523_v32, %v520_v31  ;;  %v547_v54 = vmul.f32 %v546_v40, %v1599_v29  ;;  %v508_v61 = vmul.f32 %v507_v49, %v1662_v18 }
  0xb4   : > { %s1700_s2 = sld [smem:[#allocation2 + $0x59]]  ;;  %v405_v4 = vadd.f32 %v404_v57, %v401_v56  ;;  %v550_v55 = vmul.f32 %v549_v41, %v1605_v43  ;;  %v486_v57 = vadd.f32 %v485_v37, %v482_v28  ;;  %v553_v59 = vstv %s1686_s17 }
  0xb5   : > { %v430_v53 = vstv %s2175_s15  ;;  %s1703_s6 = sld [smem:[#allocation2 + $0x6d]]  ;;  %v528_v1 = vadd.f32 %v527_v51, %v524_v35  ;;  %v539_v37 = vmul.f32 %v538_v14, %v1681_v36 }
  0xb6   : > { %s2180_s23 = sld [smem:[#allocation22_spill]]  ;;  %v431_v63 = vmul.f32 %v430_v53, %v1681_v36  ;;  %v530_v53 = vstv %s1655_s19 }
  0xb7   : > { %s2181_s26 = sld [smem:[#allocation11_spill]]  ;;  %v557_v9 = vstv %s1690_s21 }
  0xb8   : > { %2176 = sst [smem:[#allocation10_spill]] %s1695_s25  ;;  %v432_v10 = vadd.f32 %v431_v63, %v428_v62  ;;  %v558_v23 = vmul.f32 %v557_v9, %v1632_v48 }
  0xb9   : > { %s1707_s25 = sld [smem:[#allocation2 + $0x5a]]  ;;  %v457_v0 = vstv %s2177_s13 }
  0xba   : > { %2178 = sst [smem:[#allocation13_spill]] %s1700_s2  ;;  %v458_v7 = vmul.f32 %v457_v0, %v1681_v36  ;;  %v512_v0 = vmul.f32 %v511_v52, %v1681_v36 }
  0xbb   : > { %2179 = sst [smem:[#allocation16_spill]] %s1703_s6 }
  0xbc   : > { %s1711_s28 = sld [smem:[#allocation2 + $0x5b]]  ;;  %v380_v3 = vstv %s2180_s23  ;;  %v459_v20 = vadd.f32 %v458_v7, %v455_v6 }
  0xbd   : > { %s2182_s10 = sld [smem:[#allocation15_spill]]  ;;  %v407_v5 = vstv %s2181_s26  ;;  %v381_v15 = vadd.f32 %v380_v3, %v378_v2  ;;  %v531_v2 = vmul.f32 %v530_v53, %v1632_v48  ;;  %v534_v3 = vstv %s1660_s14 }
  0xbe   : > { %s1716_s15 = sld [smem:[#allocation2 + $0x5c]]  ;;  %v408_v16 = vadd.f32 %v407_v5, %v405_v4  ;;  %v462_v39 = vadd.f32 %v461_v25, %v459_v20  ;;  %v551_v4 = vadd.f32 %v550_v55, %v547_v54  ;;  %v554_v5 = vmul.f32 %v553_v59, %v1615_v50 }
  0xbf   : > { %s1718_s6 = sld [smem:[#allocation2 + $0x5d]]  ;;  %v1754_v33 = vmax.f32 %v381_v15, 0.0  ;;  %v573_v62 = vstv %s1707_s25  ;;  %v535_v13 = vmul.f32 %v534_v3, %v1662_v18  ;;  %v532_v21 = vadd.f32 %v531_v2, %v528_v1 }
  0xc0   : > { %s1722_s2 = sld [smem:[#allocation2 + $0x5e]]  ;;  %v1756_v34 = vmax.f32 %v408_v16, 0.0  ;;  %v1783_v56 = vmax.f32 %v462_v39, 0.0  ;;  %v555_v22 = vadd.f32 %v554_v5, %v551_v4  ;;  %v489_v25 = vadd.f32 %v488_v47, %v486_v57 }
  0xc1   : > { %s1726_s24 = sld [smem:[#allocation2 + $0x5f]]  ;;  %v536_v40 = vadd.f32 %v535_v13, %v532_v21 }
  0xc2   : > { %s1729_s13 = sld [smem:[#allocation2 + $0x6e]]  ;;  %v576_v63 = vstv %s1711_s28  ;;  %v559_v41 = vadd.f32 %v558_v23, %v555_v22  ;;  %v1843_v46 = vmax.f32 %v489_v25, 0.0 }
  0xc3   : > { %v434_v12 = vstv %s2182_s10  ;;  %s1734_s26 = sld [smem:[#allocation2 + $0x60]]  ;;  %v577_v11 = vmul.f32 %v576_v63, %v1605_v43  ;;  %v540_v59 = vadd.f32 %v539_v37, %v536_v40 }
  0xc4   : > { %s1738_s23 = sld [smem:[#allocation2 + $0x61]]  ;;  %v435_v24 = vadd.f32 %v434_v12, %v432_v10  ;;  %v574_v10 = vmul.f32 %v573_v62, %v1599_v29  ;;  %v505_v12 = vadd.f32 %v504_v58, %v501_v60  ;;  %v580_v15 = vstv %s1716_s15 }
  0xc5   : > { %s1742_s1 = sld [smem:[#allocation2 + $0x62]]  ;;  %v584_v30 = vstv %s1718_s6 }
  0xc6   : > { %s1747_s16 = sld [smem:[#allocation2 + $0x63]]  ;;  %v1766_v42 = vmax.f32 %v435_v24, 0.0  ;;  %v578_v27 = vadd.f32 %v577_v11, %v574_v10  ;;  %v585_v35 = vmul.f32 %v584_v30, %v1632_v48  ;;  %v588_v51 = vstv %s1722_s2 }
  0xc7   : > { %s1752_s0 = sld [smem:[#allocation2 + $0x64]]  ;;  %v592_v3 = vstv %s1726_s24 }
  0xc8   : > { %s1760_s9 = sld [smem:[#allocation2 + $0x65]] }
  0xc9   : > { %s1764_s20 = sld [smem:[#allocation2 + $0x6f]]  ;;  %v600_v6 = vstv %s1734_s26 }
  0xca   : > { %s1770_s27 = sld [smem:[#allocation2 + $0x70]]  ;;  %v603_v7 = vstv %s1738_s23  ;;  %v601_v16 = vmul.f32 %v600_v6, %v1599_v29  ;;  %v581_v29 = vmul.f32 %v580_v15, %v1615_v50  ;;  %v593_v15 = vmul.f32 %v592_v3, %v1681_v36 }
  0xcb   : > { %s1775_s8 = sld [smem:[#allocation2 + $0x71]]  ;;  %v604_v17 = vmul.f32 %v603_v7, %v1605_v43  ;;  %v607_v24 = vstv %s1742_s1  ;;  %v509_v43 = vadd.f32 %v508_v61, %v505_v12 }
  0xcc   : > { %s1781_s4 = sld [smem:[#allocation2 + $0x72]]  ;;  %v608_v39 = vmul.f32 %v607_v24, %v1615_v50  ;;  %v611_v45 = vstv %s1747_s16  ;;  %v582_v49 = vadd.f32 %v581_v29, %v578_v27 }
  0xcd   : > { %s1787_s12 = sld [smem:[#allocation2 + $0x73]]  ;;  %v605_v38 = vadd.f32 %v604_v17, %v601_v16  ;;  %v513_v50 = vadd.f32 %v512_v0, %v509_v43  ;;  %v612_v57 = vmul.f32 %v611_v45, %v1632_v48  ;;  %v615_v62 = vstv %s1752_s0 }
  0xce   : > { %s1792_s30 = sld [smem:[#allocation2 + $0x74]]  ;;  %v586_v63 = vadd.f32 %v585_v35, %v582_v49  ;;  %v589_v0 = vmul.f32 %v588_v51, %v1662_v18  ;;  %v616_v7 = vmul.f32 %v615_v62, %v1662_v18  ;;  %v619_v11 = vstv %s1760_s9 }
  0xcf   : > { %s1797_s5 = sld [smem:[#allocation2 + $0x75]]  ;;  %v609_v55 = vadd.f32 %v608_v39, %v605_v38  ;;  %v516_v48 = vadd.f32 %v515_v8, %v513_v50  ;;  %v620_v22 = vmul.f32 %v619_v11, %v1681_v36  ;;  %v596_v43 = vstv %s1729_s13 }
  0xd0   : > { %s1802_s29 = sld [smem:[#allocation2 + $0x76]]  ;;  %v627_v19 = vstv %s1770_s27  ;;  %v590_v14 = vadd.f32 %v589_v0, %v586_v63 }
  0xd1   : > { %s1808_s18 = sld [smem:[#allocation2 + $0x77]]  ;;  %v630_v20 = vstv %s1775_s8  ;;  %v628_v31 = vmul.f32 %v627_v19, %v1754_v33  ;;  %v613_v6 = vadd.f32 %v612_v57, %v609_v55 }
  0xd2   : > { %s2183_s19 = sld [smem:[#allocation10_spill]]  ;;  %v631_v32 = vmul.f32 %v630_v20, %v1756_v34  ;;  %v634_v28 = vstv %s1781_s4  ;;  %v594_v29 = vadd.f32 %v593_v15, %v590_v14 }
  0xd3   : > { %s1813_s14 = sld [smem:[#allocation2 + $0x78]]  ;;  %v635_v53 = vmul.f32 %v634_v28, %v1766_v42  ;;  %v638_v58 = vstv %s1787_s12  ;;  %v617_v21 = vadd.f32 %v616_v7, %v613_v6 }
  0xd4   : > { %s1819_s3 = sld [smem:[#allocation2 + $0x79]]  ;;  %v632_v52 = vadd.f32 %v631_v32, %v628_v31  ;;  %v639_v5 = vmul.f32 %v638_v58, %v1783_v56  ;;  %v642_v9 = vstv %s1792_s30  ;;  %v597_v49 = vadd.f32 %v596_v43, %v594_v29 }
  0xd5   : > { %s1823_s11 = sld [smem:[#allocation2 + $0xac]]  ;;  %v643_v20 = vmul.f32 %v642_v9, %v1843_v46  ;;  %v646_v23 = vstv %s1797_s5  ;;  %v621_v38 = vadd.f32 %v620_v22, %v617_v21 }
  0xd6   : > { %s1827_s22 = sld [smem:[#allocation2 + $0x7a]]  ;;  %v636_v4 = vadd.f32 %v635_v53, %v632_v52  ;;  %v650_v39 = vstv %s1802_s29  ;;  %v1934_v0 = vmax.f32 %v597_v49, 0.0 }
  0xd7   : > { %s2184_s17 = sld [smem:[#allocation13_spill]]  ;;  %v654_v58 = vstv %s1808_s18 }
  0xd8   : > { %v561_v26 = vstv %s2183_s19  ;;  %s1832_s21 = sld [smem:[#allocation2 + $0x7b]]  ;;  %v640_v19 = vadd.f32 %v639_v5, %v636_v4 }
  0xd9   : > { %s1837_s25 = sld [smem:[#allocation2 + $0x7c]]  ;;  %v562_v44 = vmul.f32 %v561_v26, %v1662_v18  ;;  %v1886_v18 = vmax.f32 %v516_v48, 0.0  ;;  %v658_v3 = vstv %s1813_s14 }
  0xda   : > { %s2185_s28 = sld [smem:[#allocation18_spill]]  ;;  %v644_v31 = vadd.f32 %v643_v20, %v640_v19  ;;  %v659_v11 = vmul.f32 %v658_v3, %v1934_v0 }
  0xdb   : > { %s1841_s6 = sld [smem:[#allocation2 + $0x7d]]  ;;  %v563_v60 = vadd.f32 %v562_v44, %v559_v41  ;;  %v647_v32 = vmul.f32 %v646_v23, %v1886_v18 }
  0xdc   : > { %s1847_s10 = sld [smem:[#allocation2 + $0x7e]]  ;;  %v670_v1 = vstv %s1827_s22 }
  0xdd   : > { %v565_v47 = vstv %s2184_s17  ;;  %s1851_s15 = sld [smem:[#allocation2 + $0x7f]]  ;;  %v671_v12 = vmul.f32 %v670_v1, %v1754_v33  ;;  %v648_v53 = vadd.f32 %v647_v32, %v644_v31 }
  0xde   : > { %s1856_s26 = sld [smem:[#allocation2 + $0x80]]  ;;  %v566_v61 = vmul.f32 %v565_v47, %v1681_v36  ;;  %v673_v2 = vstv %s1832_s21  ;;  %v623_v36 = vstv %s1764_s20 }
  0xdf   : > { %s1860_s2 = sld [smem:[#allocation2 + $0x81]]  ;;  %v674_v8 = vmul.f32 %v673_v2, %v1756_v34  ;;  %v677_v16 = vstv %s1837_s25  ;;  %v624_v57 = vadd.f32 %v623_v36, %v621_v38 }
  0xe0   : > { %v542_v54 = vstv %s2185_s28  ;;  %s1865_s23 = sld [smem:[#allocation2 + $0x82]]  ;;  %v567_v13 = vadd.f32 %v566_v61, %v563_v60  ;;  %v678_v26 = vmul.f32 %v677_v16, %v1766_v42 }
  0xe1   : > { %s1871_s1 = sld [smem:[#allocation2 + $0x83]]  ;;  %v543_v10 = vadd.f32 %v542_v54, %v540_v59  ;;  %v675_v25 = vadd.f32 %v674_v8, %v671_v12  ;;  %v681_v30 = vstv %s1841_s6  ;;  %v1945_v7 = vmax.f32 %v624_v57, 0.0 }
  0xe2   : > { %s2186_s16 = sld [smem:[#allocation16_spill]]  ;;  %v682_v44 = vmul.f32 %v681_v30, %v1783_v56  ;;  %v685_v35 = vstv %s1847_s10  ;;  %v662_v12 = vstv %s1819_s3 }
  0xe3   : > { %s1875_s0 = sld [smem:[#allocation2 + $0xad]]  ;;  %v1896_v24 = vmax.f32 %v543_v10, 0.0  ;;  %v679_v41 = vadd.f32 %v678_v26, %v675_v25  ;;  %v686_v61 = vmul.f32 %v685_v35, %v1843_v46  ;;  %v689_v1 = vstv %s1851_s15 }
  0xe4   : > { %s1880_s7 = sld [smem:[#allocation2 + $0x84]]  ;;  %v690_v10 = vmul.f32 %v689_v1, %v1886_v18  ;;  %v693_v8 = vstv %s1856_s26  ;;  %v663_v32 = vmul.f32 %v662_v12, %v1945_v7 }
  0xe5   : > { %s1884_s24 = sld [smem:[#allocation2 + $0x85]]  ;;  %v651_v54 = vmul.f32 %v650_v39, %v1896_v24  ;;  %v683_v60 = vadd.f32 %v682_v44, %v679_v41  ;;  %v694_v25 = vmul.f32 %v693_v8, %v1896_v24  ;;  %v697_v29 = vstv %s1860_s2 }
  0xe6   : > { %s1890_s9 = sld [smem:[#allocation2 + $0x86]]  ;;  %v701_v49 = vstv %s1865_s23 }
  0xe7   : > { %s1894_s27 = sld [smem:[#allocation2 + $0x87]]  ;;  %v652_v2 = vadd.f32 %v651_v54, %v648_v53  ;;  %v687_v9 = vadd.f32 %v686_v61, %v683_v60  ;;  %v702_v61 = vmul.f32 %v701_v49, %v1934_v0 }
  0xe8   : > { %v569_v17 = vstv %s2186_s16  ;;  %s1899_s8 = sld [smem:[#allocation2 + $0x88]] }
  0xe9   : > { %v570_v27 = vadd.f32 %v569_v17, %v567_v13  ;;  %s1903_s4 = sld [smem:[#allocation2 + $0x89]]  ;;  %v691_v23 = vadd.f32 %v690_v10, %v687_v9 }
  0xea   : > { %v713_v37 = vstv %s1880_s7  ;;  %s1908_s12 = sld [smem:[#allocation2 + $0x8a]] }
  0xeb   : > { %v714_v28 = vmul.f32 %v713_v37, %v1754_v33  ;;  %v716_v40 = vstv %s1884_s24  ;;  %s1913_s30 = sld [smem:[#allocation2 + $0x8b]]  ;;  %v1925_v52 = vmax.f32 %v570_v27, 0.0  ;;  %v695_v44 = vadd.f32 %v694_v25, %v691_v23 }
  0xec   : > { %v717_v45 = vmul.f32 %v716_v40, %v1756_v34  ;;  %v720_v47 = vstv %s1890_s9  ;;  %s1918_s13 = sld [smem:[#allocation2 + $0x8c]] }
  0xed   : > { %v721_v50 = vmul.f32 %v720_v47, %v1766_v42  ;;  %v724_v51 = vstv %s1894_s27  ;;  %s1923_s20 = sld [smem:[#allocation2 + $0x8d]]  ;;  %v655_v48 = vmul.f32 %v654_v58, %v1925_v52 }
  0xee   : > { %v718_v55 = vadd.f32 %v717_v45, %v714_v28  ;;  %s1928_s5 = sld [smem:[#allocation2 + $0xae]]  ;;  %v725_v59 = vmul.f32 %v724_v51, %v1783_v56  ;;  %v728_v63 = vstv %s1899_s8  ;;  %v698_v45 = vmul.f32 %v697_v29, %v1925_v52 }
  0xef   : > { %s1176_s29 = sld [smem:[#allocation2 + $0x8e]]  ;;  %v729_v5 = vmul.f32 %v728_v63, %v1843_v46  ;;  %v732_v6 = vstv %s1903_s4  ;;  %v656_v14 = vadd.f32 %v655_v48, %v652_v2 }
  0xf0   : > { %v722_v62 = vadd.f32 %v721_v50, %v718_v55  ;;  %s1177_s19 = sld [smem:[#allocation2 + $0x8f]]  ;;  %v733_v15 = vmul.f32 %v732_v6, %v1886_v18  ;;  %v736_v20 = vstv %s1908_s12  ;;  %v699_v60 = vadd.f32 %v698_v45, %v695_v44 }
  0xf1   : > { %s1178_s22 = sld [smem:[#allocation2 + $0x90]]  ;;  %v660_v31 = vadd.f32 %v659_v11, %v656_v14  ;;  %v737_v37 = vmul.f32 %v736_v20, %v1896_v24  ;;  %v740_v28 = vstv %s1913_s30 }
  0xf2   : > { %s1939_s18 = sld [smem:[#allocation2 + $0x91]]  ;;  %v726_v4 = vadd.f32 %v725_v59, %v722_v62  ;;  %v741_v53 = vmul.f32 %v740_v28, %v1925_v52  ;;  %v744_v57 = vstv %s1918_s13  ;;  %v705_v62 = vstv %s1871_s1 }
  0xf3   : > { %s1943_s17 = sld [smem:[#allocation2 + $0x92]]  ;;  %v664_v51 = vadd.f32 %v663_v32, %v660_v31  ;;  %v709_v32 = vstv %s1875_s0 }
  0xf4   : > { %s1948_s21 = sld [smem:[#allocation2 + $0x93]]  ;;  %v730_v19 = vadd.f32 %v729_v5, %v726_v4  ;;  %v745_v4 = vmul.f32 %v744_v57, %v1934_v0 }
  0xf5   : > { %v756_v13 = vstv %s1176_s29  ;;  %s1953_s14 = sld [smem:[#allocation2 + $0x94]] }
  0xf6   : > { %v757_v16 = vmul.f32 %v756_v13, %v1754_v33  ;;  %v759_v17 = vstv %s1177_s19  ;;  %s1957_s25 = sld [smem:[#allocation2 + $0x95]]  ;;  %v734_v39 = vadd.f32 %v733_v15, %v730_v19  ;;  %v748_v13 = vstv %s1923_s20 }
  0xf7   : > { %v760_v21 = vmul.f32 %v759_v17, %v1756_v34  ;;  %v763_v22 = vstv %s1178_s22  ;;  %s1961_s3 = sld [smem:[#allocation2 + $0x96]]  ;;  %v706_v17 = vmul.f32 %v705_v62, %v1945_v7 }
  0xf8   : > { %v764_v26 = vmul.f32 %v763_v22, %v1766_v42  ;;  %v767_v27 = vstv %s1939_s18  ;;  %s1966_s28 = sld [smem:[#allocation2 + $0x97]]  ;;  %v738_v55 = vadd.f32 %v737_v37, %v734_v39  ;;  %v703_v22 = vadd.f32 %v702_v61, %v699_v60 }
  0xf9   : > { %v761_v43 = vadd.f32 %v760_v21, %v757_v16  ;;  %v768_v30 = vmul.f32 %v767_v27, %v1783_v56  ;;  %v771_v36 = vstv %s1943_s17  ;;  %s1971_s6 = sld [smem:[#allocation2 + $0xaf]]  ;;  %v666_v27 = vstv %s1823_s11 }
  0xfa   : > { %v775_v38 = vstv %s1948_s21  ;;  %s1187_s10 = sld [smem:[#allocation2 + $0x98]]  ;;  %v772_v41 = vmul.f32 %v771_v36, %v1843_v46  ;;  %v742_v10 = vadd.f32 %v741_v53, %v738_v55  ;;  %v2040_v28 = vadd.f32 %v666_v27, %v664_v51 }
  0xfb   : > { %v765_v40 = vadd.f32 %v764_v26, %v761_v43  ;;  %s1978_s15 = sld [smem:[#allocation2 + $0x99]]  ;;  %v779_v47 = vstv %s1953_s14  ;;  %v776_v50 = vmul.f32 %v775_v38, %v1886_v18  ;;  %v749_v43 = vmul.f32 %v748_v13, %v1945_v7 }
  0xfc   : > { %s1982_s26 = sld [smem:[#allocation2 + $0x9a]]  ;;  %v783_v54 = vstv %s1957_s25  ;;  %v780_v59 = vmul.f32 %v779_v47, %v1896_v24  ;;  %v746_v29 = vadd.f32 %v745_v4, %v742_v10  ;;  %v752_v47 = vstv %s1928_s5 }
  0xfd   : > { %v769_v35 = vadd.f32 %v768_v30, %v765_v40  ;;  %s1986_s2 = sld [smem:[#allocation2 + $0x9b]]  ;;  %v784_v2 = vmul.f32 %v783_v54, %v1925_v52  ;;  %v787_v5 = vstv %s1961_s3  ;;  %v707_v40 = vadd.f32 %v706_v17, %v703_v22 }
  0xfe   : > { %s1990_s16 = sld [smem:[#allocation2 + $0x9c]]  ;;  %v788_v20 = vmul.f32 %v787_v5, %v1934_v0  ;;  %v791_v23 = vstv %s1966_s28  ;;  %v750_v45 = vadd.f32 %v749_v43, %v746_v29 }
  0xff   : > { %v773_v58 = vadd.f32 %v772_v41, %v769_v35  ;;  %s1994_s23 = sld [smem:[#allocation2 + $0x9d]]  ;;  %v792_v38 = vmul.f32 %v791_v23, %v1945_v7 }
 0x100   : > { %v799_v63 = vstv %s1187_s10  ;;  %s1998_s7 = sld [smem:[#allocation2 + $0x9e]] }
 0x101   : > { %v777_v1 = vadd.f32 %v776_v50, %v773_v58  ;;  %v800_v48 = vmul.f32 %v799_v63, %v1754_v33  ;;  %v802_v3 = vstv %s1978_s15  ;;  %s2003_s24 = sld [smem:[#allocation2 + $0x9f]] }
 0x102   : > { %v803_v6 = vmul.f32 %v802_v3, %v1756_v34  ;;  %v806_v9 = vstv %s1982_s26  ;;  %s2009_s1 = sld [smem:[#allocation2 + $0xa0]]  ;;  %v2067_v3 = vadd.f32 %v709_v32, %v707_v40 }
 0x103   : > { %v781_v11 = vadd.f32 %v780_v59, %v777_v1  ;;  %v807_v12 = vmul.f32 %v806_v9, %v1766_v42  ;;  %v810_v8 = vstv %s1986_s2  ;;  %s2013_s9 = sld [smem:[#allocation2 + $0xa1]]  ;;  %v795_v1 = vstv %s1971_s6 }
 0x104   : > { %v804_v14 = vadd.f32 %v803_v6, %v800_v48  ;;  %v811_v15 = vmul.f32 %v810_v8, %v1783_v56  ;;  %v814_v16 = vstv %s1990_s16  ;;  %s2018_s27 = sld [smem:[#allocation2 + $0xb0]] }
 0x105   : > { %v785_v19 = vadd.f32 %v784_v2, %v781_v11  ;;  %v818_v21 = vstv %s1994_s23  ;;  %s2023_s8 = sld [smem:[#allocation2 + $0xa2]]  ;;  %v815_v26 = vmul.f32 %v814_v16, %v1843_v46 }
 0x106   : > { %v808_v25 = vadd.f32 %v807_v12, %v804_v14  ;;  %s2027_s4 = sld [smem:[#allocation2 + $0xa3]]  ;;  %v822_v30 = vstv %s1998_s7  ;;  %v819_v31 = vmul.f32 %v818_v21, %v1886_v18  ;;  %v668_v12 = vmax.f32 %v2040_v28, 0.0 }
 0x107   : > { %s1200_s12 = sld [smem:[#allocation2 + $0xa4]]  ;;  %v789_v37 = vadd.f32 %v788_v20, %v785_v19  ;;  %v826_v39 = vstv %s2003_s24  ;;  %v823_v44 = vmul.f32 %v822_v30, %v1896_v24 }
 0x108   : > { %v812_v36 = vadd.f32 %v811_v15, %v808_v25  ;;  %s2033_s30 = sld [smem:[#allocation2 + $0xa5]]  ;;  %v830_v49 = vstv %s2009_s1  ;;  %v827_v53 = vmul.f32 %v826_v39, %v1925_v52  ;;  %v711_v15 = vmax.f32 %v2067_v3, 0.0 }
 0x109   : > { %s2038_s11 = sld [smem:[#allocation2 + $0xa6]]  ;;  %v793_v55 = vadd.f32 %v792_v38, %v789_v37  ;;  %v834_v57 = vstv %s2013_s9  ;;  %v831_v61 = vmul.f32 %v830_v49, %v1934_v0 }
 0x10a   : > { %v816_v41 = vadd.f32 %v815_v26, %v812_v36  ;;  %s2043_s13 = sld [smem:[#allocation2 + $0xa7]]  ;;  %v835_v4 = vmul.f32 %v834_v57, %v1945_v7  ;;  %v838_v8 = vstv %s2018_s27 }
 0x10b   : > { %v842_v35 = vstv %s2023_s8  ;;  %s2048_s0 = sld [smem:[#allocation2 + $0xa8]]  ;;  %v2072_v10 = vadd.f32 %v795_v1, %v793_v55 }
 0x10c   : > { %v820_v50 = vadd.f32 %v819_v31, %v816_v41  ;;  %v843_v51 = vmul.f32 %v842_v35, %v1754_v33  ;;  %v845_v54 = vstv %s2027_s4  ;;  %s2053_s20 = sld [smem:[#allocation2 + $0xa9]] }
 0x10d   : > { %v846_v58 = vmul.f32 %v845_v54, %v1756_v34  ;;  %v849_v59 = vstv %s1200_s12  ;;  %s2060_s5 = sld [smem:[#allocation2 + $0xaa]]  ;;  %v797_v21 = vmax.f32 %v2072_v10, 0.0 }
 0x10e   : > { %v824_v60 = vadd.f32 %v823_v44, %v820_v50  ;;  %v850_v62 = vmul.f32 %v849_v59, %v1766_v42  ;;  %v853_v63 = vstv %s2033_s30  ;;  %s2065_s29 = sld [smem:[#allocation2 + $0xab]]  ;;  %v753_v42 = vadd.f32 %v752_v47, %v750_v45 }
 0x10f   : > { %v847_v33 = vadd.f32 %v846_v58, %v843_v51  ;;  %v854_v2 = vmul.f32 %v853_v63, %v1783_v56  ;;  %v857_v48 = vstv %s2038_s11  ;;  %s1209_s19 = sld [smem:[#allocation2 + $0xb2]] }
 0x110   : > { %v828_v34 = vadd.f32 %v827_v53, %v824_v60  ;;  %v861_v5 = vstv %s2043_s13  ;;  %v858_v9 = vmul.f32 %v857_v48, %v1843_v46  ;;  %s1210_s22 = sld [smem:[#allocation2 + $0xb3]]  ;;  %v754_v46 = vmax.f32 %v753_v42, 0.0 }
 0x111   : > { %v851_v6 = vadd.f32 %v850_v62, %v847_v33  ;;  %v865_v11 = vstv %s2048_s0  ;;  %s1211_s18 = sld [smem:[#allocation2 + $0xb4]]  ;;  %v862_v14 = vmul.f32 %v861_v5, %v1886_v18 }
 0x112   : > { %v832_v56 = vadd.f32 %v831_v61, %v828_v34  ;;  %s2078_s17 = sld [smem:[#allocation2 + $0xb5]]  ;;  %v869_v17 = vstv %s2053_s20  ;;  %v866_v20 = vmul.f32 %v865_v11, %v1896_v24 }
 0x113   : > { %v855_v13 = vadd.f32 %v854_v2, %v851_v6  ;;  %s2082_s21 = sld [smem:[#allocation2 + $0xb6]]  ;;  %v873_v18 = vstv %s2060_s5  ;;  %v870_v26 = vmul.f32 %v869_v17, %v1925_v52 }
 0x114   : > { %v836_v16 = vadd.f32 %v835_v4, %v832_v56  ;;  %s2085_s14 = sld [smem:[#allocation2 + $0xb1]]  ;;  %v877_v43 = vstv %s2065_s29  ;;  %v874_v31 = vmul.f32 %v873_v18, %v1934_v0 }
 0x115   : > { %v859_v19 = vadd.f32 %v858_v9, %v855_v13  ;;  %v885_v23 = vstv %s1209_s19  ;;  %s2089_s25 = sld [smem:[#allocation2 + $0xb7]]  ;;  %v878_v52 = vmul.f32 %v877_v43, %v1945_v7 }
 0x116   : > { %v839_v22 = vadd.f32 %v838_v8, %v836_v16  ;;  %v886_v27 = vmul.f32 %v885_v23, %v668_v12  ;;  %v888_v29 = vstv %s1210_s22  ;;  %s1216_s3 = sld [smem:[#allocation2 + $0xb8]] }
 0x117   : > { %v863_v25 = vadd.f32 %v862_v14, %v859_v19  ;;  %v889_v30 = vmul.f32 %v888_v29, %v711_v15  ;;  %v892_v24 = vstv %s1211_s18  ;;  %s1217_s28 = sld [smem:[#allocation2 + $0xb9]] }
 0x118   : > { %v893_v32 = vmul.f32 %v892_v24, %v754_v46  ;;  %v896_v37 = vstv %s2078_s17  ;;  %s1218_s6 = sld [smem:[#allocation2 + $0xba]]  ;;  %v840_v38 = vmax.f32 %v839_v22, 0.0 }
 0x119   : > { %v867_v36 = vadd.f32 %v866_v20, %v863_v25  ;;  %v890_v39 = vadd.f32 %v889_v30, %v886_v27  ;;  %s1219_s10 = sld [smem:[#allocation2 + $0xbb]]  ;;  %v897_v40 = vmul.f32 %v896_v37, %v797_v21  ;;  %v900_v41 = vstv %s2082_s21 }
 0x11a   : > { %s1220_s15 = sld [smem:[#allocation2 + $0xbc]]  ;;  %v881_v49 = vstv %s2085_s14  ;;  %v901_v0 = vmul.f32 %v900_v41, %v840_v38 }
 0x11b   : > { %v871_v28 = vadd.f32 %v870_v26, %v867_v36  ;;  %v894_v44 = vadd.f32 %v893_v32, %v890_v39  ;;  %s1221_s26 = sld [smem:[#allocation2 + $0xbd]]  ;;  %v904_v62 = vstv %s2089_s25 }
 0x11c   : > { %v912_v47 = vstv %s1216_s3  ;;  %s2098_s2 = sld [smem:[#allocation2 + $0xbe]] }
 0x11d   : > { %v875_v45 = vadd.f32 %v874_v31, %v871_v28  ;;  %v913_v35 = vmul.f32 %v912_v47, %v668_v12  ;;  %v915_v50 = vstv %s1217_s28  ;;  %v898_v51 = vadd.f32 %v897_v40, %v894_v44  ;;  %s1222_s16 = sld [smem:[#allocation2 + $0xbf]] }
 0x11e   : > { %v916_v54 = vmul.f32 %v915_v50, %v711_v15  ;;  %v919_v55 = vstv %s1218_s6  ;;  %s2187_s23 = sld [smem:[#allocation7_spill]] }
 0x11f   : > { %v879_v53 = vadd.f32 %v878_v52, %v875_v45  ;;  %v920_v57 = vmul.f32 %v919_v55, %v754_v46  ;;  %v923_v7 = vstv %s1219_s10  ;;  %s1223_s7 = sld [smem:[#allocation2 + $0xc0]]  ;;  %v902_v33 = vadd.f32 %v901_v0, %v898_v51 }
 0x120   : > { %v917_v59 = vadd.f32 %v916_v54, %v913_v35  ;;  %v924_v60 = vmul.f32 %v923_v7, %v797_v21  ;;  %v927_v61 = vstv %s1220_s15  ;;  %s1224_s24 = sld [smem:[#allocation2 + $0xc1]] }
 0x121   : > { %v882_v58 = vadd.f32 %v881_v49, %v879_v53  ;;  %v931_v63 = vstv %s1221_s26  ;;  %v928_v48 = vmul.f32 %v927_v61, %v840_v38  ;;  %s1225_s1 = sld [smem:[#allocation2 + $0xc2]] }
 0x122   : > { %v921_v2 = vadd.f32 %v920_v57, %v917_v59  ;;  %v908_v5 = vstv %s2098_s2  ;;  %s2188_s4 = sld [smem:[#allocation28_spill]] }
 0x123   : > { %v883_v1 = vmax.f32 %v882_v58, 0.0  ;;  %v935_v9 = vstv %s1222_s16 }
 0x124   : > { %v925_v34 = vadd.f32 %v924_v60, %v921_v2  ;;  %p191_p11 = scmp.lt.s32.totalorder %s2187_s23, 1 }
 0x125   : > { %v905_v3 = vmul.f32 %v904_v62, %v883_v1  ;;  %v932_v4 = vmul.f32 %v931_v63, %v883_v1  ;;  %v939_v11 = vstv %s1223_s7 }
 0x126   : > { %v929_v6 = vadd.f32 %v928_v48, %v925_v34  ;;  %s2193_s23 = smov (!%p191_p11, %s2187_s23), 1  ;;  %v942_v13 = vstv %s1224_s24 }
 0x127   : > { %v906_v42 = vadd.f32 %v905_v3, %v902_v33  ;;  %s1030_s9 = sshll.u32 %s2193_s23, 3  ;;  %v946_v17 = vstv %s1225_s1 }
 0x128   : > { %v933_v56 = vadd.f32 %v932_v4, %v929_v6  ;;  %s194_s12 = scalar_lea.vmem %s2188_s4, %s1030_s9 }
 0x129   : > { %v909_v10 = vadd.f32 %v908_v5, %v906_v42 }
 0x12a   : > { %v936_v8 = vadd.f32 %v935_v9, %v933_v56 }
 0x12b   : > { %v910_v12 = vmax.f32 %v909_v10, 0.0 }
 0x12c   : > { %v937_v14 = vmax.f32 %v936_v8, 0.0 }
 0x12d   : > { %v940_v15 = vmul.f32 %v939_v11, %v910_v12 }
 0x12e   : > { %v943_v16 = vmul.f32 %v942_v13, %v937_v14 }
 0x130   : > { %v944_v46 = vadd.f32 %v943_v16, %v940_v15 }
 0x132   : > { %v947_v19 = vadd.f32 %v946_v17, %v944_v46 }
 0x134   : > { %948 = vst [vmem:[%s194_s12] sm:$0xff] %v947_v19 }
 0x135 PF: > { %s2189_s11 = sld [smem:[#allocation8_spill]] }
 0x136   : > { %s2190_s9 = sld [smem:[#allocation6_spill]] }
 0x137   : > { %s2191_s10 = sld [smem:[#allocation9_spill]] }
 0x13b   : > { %p10_p12 = scmp.ge.s32.totalorder %s2189_s11, 4  }
 0x13d   :  { %12 = sbr.rel (!%p10_p12) target bundleno = 6 (0x6), region = 107 }
 0x142   :  { %968 = vsyncpa [#allocation3], 1 }
 0x143   :  { %970 = vsyncpa [#allocation3 + $0x1], 1 }

</bundles_post_ra>
